<compile_context>
chip_gen: v7x
topology: tpu7x:2x2x1
jax: 0.10.0
libtpu: 0.0.40
codegen_flags: <defaults>
</compile_context>

<pallas_src>
import functools

import jax
import jax.numpy as jnp
from jax.experimental import pallas as pl
from jax.experimental.pallas import tpu as pltpu

LANE = 128
SUBLANE = 8


def _round_up(n, m):
    return ((n + m - 1) // m) * m


# ----------------------------------------------------------------------------
# Kernel
# ----------------------------------------------------------------------------
def polynet_kernel(x_ref, w1_ref, sb1_ref, w2_ref, sb2_ref, w3_ref, sb3_ref,
                   o_ref, *, degree):
    """Fused 3-layer polynomial MLP on one (TB, Din_p) batch tile.

    sb*_ref hold the pre-scaled biases (degree * b), shape (1, Dout), f32.
    Per layer: p = h + h**2 + ... + h**degree computed in f32 on the VPU,
    then ONE MXU matmul (operand cast to the weight dtype, f32 accumulate).
    """

    def poly_layer(h, w_ref, sb_ref):
        p = h
        hp = h
        # Static Python loop — unrolled at trace time (degree is small, e.g. 3).
        for _ in range(2, degree + 1):
            hp = hp * h                       # h**i, elementwise on the VPU (f32)
            p = p + hp
        return jnp.dot(p.astype(w_ref.dtype), w_ref[...],
                       preferred_element_type=jnp.float32) + sb_ref[...]

    h1 = poly_layer(x_ref[...], w1_ref, sb1_ref)
    h2 = poly_layer(h1, w2_ref, sb2_ref)
    y = poly_layer(h2, w3_ref, sb3_ref)
    o_ref[...] = y.astype(o_ref.dtype)


# ----------------------------------------------------------------------------
# Parameter prep (one-time)
# ----------------------------------------------------------------------------
def prepare_params(params, degree, weight_dtype=jnp.bfloat16):
    """Pre-scale biases by `degree`, pad K (784 -> 896) and the fc3 output
    (10 -> 128) with exact zeros, and cast weights to `weight_dtype`."""
    (w1, b1), (w2, b2), (w3, b3) = params
    din, d1 = w1.shape
    d2 = w2.shape[1]
    d3 = w3.shape[1]
    din_p = _round_up(din, LANE)                 # 784 -> 896
    d3p = _round_up(max(d3, LANE), LANE)         # 10  -> 128

    w1p = jnp.zeros((din_p, d1), jnp.float32).at[:din, :].set(w1)
    w3p = jnp.zeros((d2, d3p), jnp.float32).at[:, :d3].set(w3)

    w1p = w1p.astype(weight_dtype)
    w2c = w2.astype(weight_dtype)
    w3p = w3p.astype(weight_dtype)

    sb1 = (degree * b1).reshape(1, d1).astype(jnp.float32)
    sb2 = (degree * b2).reshape(1, d2).astype(jnp.float32)
    sb3p = jnp.zeros((1, d3p), jnp.float32).at[:, :d3].set(degree * b3)

    return (w1p, sb1, w2c, sb2, w3p, sb3p, din, d3)


# ----------------------------------------------------------------------------
# Wrapper
# ----------------------------------------------------------------------------
def polynet_forward(x, prepped, degree=3, batch_tile=256):
    """Run the whole network as a single Pallas call.

    Grid iterates over batch tiles; weight/bias BlockSpecs return a constant
    block index, so they are DMA'd once and stay resident in VMEM while the
    activation tiles stream.  The batch axis is "parallel" (v7x megacore).
    """
    w1, sb1, w2, sb2, w3, sb3, in_dim, out_dim = prepped
    B, Din = x.shape
    assert Din == in_dim, (Din, in_dim)
    din_p, d1 = w1.shape
    d2 = w2.shape[1]
    d3p = w3.shape[1]

    # Batch tile: multiple of 8 sublanes, capped (VMEM-safe even on v7x's 64 MiB).
    tb = min(batch_tile, _round_up(B, SUBLANE))
    bp = _round_up(B, tb)

    # Pad batch rows and K columns with zeros (exact; garbage rows sliced off).
    if (bp, din_p) != (B, Din):
        xp = jnp.zeros((bp, din_p), x.dtype).at[:B, :Din].set(x)
    else:
        xp = x

    grid = (bp // tb,)

    flops = 2 * bp * (din_p * d1 + d1 * d2 + d2 * d3p)
    param_bytes = sum(int(a.size) * a.dtype.itemsize
                      for a in (w1, sb1, w2, sb2, w3, sb3))
    bytes_accessed = param_bytes + int(xp.size) * 4 + bp * d3p * 4

    kernel = functools.partial(polynet_kernel, degree=degree)
    y_pad = pl.pallas_call(
        kernel,
        out_shape=jax.ShapeDtypeStruct((bp, d3p), jnp.float32),
        grid=grid,
        in_specs=[
            pl.BlockSpec((tb, din_p), lambda i: (i, 0)),   # x tile (streams)
            pl.BlockSpec((din_p, d1), lambda i: (0, 0)),   # W1 (resident)
            pl.BlockSpec((1, d1), lambda i: (0, 0)),       # degree*b1
            pl.BlockSpec((d1, d2), lambda i: (0, 0)),      # W2 (resident)
            pl.BlockSpec((1, d2), lambda i: (0, 0)),       # degree*b2
            pl.BlockSpec((d2, d3p), lambda i: (0, 0)),     # W3 (lane-padded)
            pl.BlockSpec((1, d3p), lambda i: (0, 0)),      # degree*b3 (padded)
        ],
        out_specs=pl.BlockSpec((tb, d3p), lambda i: (i, 0)),
        compiler_params=pltpu.CompilerParams(
            dimension_semantics=("parallel",),
        ),
        cost_estimate=pl.CostEstimate(
            flops=flops, transcendentals=0, bytes_accessed=bytes_accessed),
    )(xp, w1, sb1, w2, sb2, w3, sb3)
    return y_pad[:B, :out_dim]


# ----------------------------------------------------------------------------
# References
# ----------------------------------------------------------------------------
def init_linear(key, fan_in, fan_out):
    """Deterministic init mimicking nn.Linear default (uniform +/- 1/sqrt(fan_in)).
    Weights stored as (in, out): transposed relative to PyTorch's (out, in)."""
    kw, kb = jax.random.split(key)
    bound = 1.0 / jnp.sqrt(jnp.float32(fan_in))
    w = jax.random.uniform(kw, (fan_in, fan_out), jnp.float32, -bound, bound)
    b = jax.random.uniform(kb, (fan_out,), jnp.float32, -bound, bound)
    return w, b


def polynet_reference(x, params, degree=3):
    """Pure-JAX f32 reference reproducing the PyTorch loop structure exactly."""
    def layer(inp, w, b):
        out = inp @ w + b
        for i in range(2, degree + 1):
            out = out + ((inp ** i) @ w + b)
        return out

    (w1, b1), (w2, b2), (w3, b3) = params
    h1 = layer(x, w1, b1)
    h2 = layer(h1, w2, b2)
    return layer(h2, w3, b3)


def polynet_kernel_math_reference(x, prepped, degree=3):
    """Plain-jnp mirror of the kernel math (same padding / same weight dtype),
    used to validate the quantized (bf16-weight) path bit-for-purpose."""
    w1, sb1, w2, sb2, w3, sb3, in_dim, out_dim = prepped
    din_p = w1.shape[0]
    xp = jnp.zeros((x.shape[0], din_p), x.dtype).at[:, :in_dim].set(x)

    def layer(h, w, sb):
        p = h
        hp = h
        for _ in range(2, degree + 1):
            hp = hp * h
            p = p + hp
        return jnp.dot(p.astype(w.dtype), w,
                       preferred_element_type=jnp.float32) + sb

    h1 = layer(xp, w1, sb1)
    h2 = layer(h1, w2, sb2)
    return layer(h2, w3, sb3)[:, :out_dim]


# ----------------------------------------------------------------------------
if __name__ == "__main__":
    degree = 3
    batch = 2
    in_dim = 28 * 28  # fixed by the module definition

    root = jax.random.PRNGKey(0)
    kx, k1, k2, k3 = jax.random.split(root, 4)

    # Small-magnitude inputs so that x**3 chains stay numerically tame.
    x = 0.5 * jax.random.normal(kx, (batch, in_dim), jnp.float32)

    params = (
        init_linear(k1, in_dim, 512),
        init_linear(k2, 512, 128),
        init_linear(k3, 128, 10),
    )
    y_ref = polynet_reference(x, params, degree=degree)

    # --- exact f32 path: validates module semantics tightly -----------------
    prepped_f32 = prepare_params(params, degree, weight_dtype=jnp.float32)
    y32 = jax.block_until_ready(polynet_forward(x, prepped_f32, degree=degree))
    assert y32.shape == (batch, 10), y32.shape
    assert jnp.allclose(y32, y_ref, rtol=1e-4, atol=1e-4), (
        float(jnp.max(jnp.abs(y32 - y_ref))))

    # --- bf16-weight fast path (half the weight DMA bytes; MXU-native) ------
    prepped_bf16 = prepare_params(params, degree, weight_dtype=jnp.bfloat16)
    y16 = jax.block_until_ready(polynet_forward(x, prepped_bf16, degree=degree))
    assert y16.shape == (batch, 10), y16.shape
    # Tight check vs. a same-precision (same bf16 weights) reference.
    y16_ref = polynet_kernel_math_reference(x, prepped_bf16, degree=degree)
    assert jnp.allclose(y16, y16_ref, rtol=5e-3, atol=5e-3), (
        float(jnp.max(jnp.abs(y16 - y16_ref))))
    # Loose sanity check vs. the exact f32 reference (bf16 quantization noise
    # gets amplified by the cubic power chains).
    assert jnp.allclose(y16, y_ref, rtol=0.25, atol=0.25), (
        float(jnp.max(jnp.abs(y16 - y_ref))))

    print("KERNEL_OK")
</pallas_src>

<mosaic_0001>
module attributes {stable_mosaic.version = 11 : i64} {
  func.func @polynet_kernel(%arg0: i32, %arg1: memref<8x896xf32, #tpu.memory_space<vmem>>, %arg2: memref<896x512xf32, #tpu.memory_space<vmem>>, %arg3: memref<1x512xf32, #tpu.memory_space<vmem>>, %arg4: memref<512x128xf32, #tpu.memory_space<vmem>>, %arg5: memref<1x128xf32, #tpu.memory_space<vmem>>, %arg6: memref<128x128xf32, #tpu.memory_space<vmem>>, %arg7: memref<1x128xf32, #tpu.memory_space<vmem>>, %arg8: memref<8x128xf32, #tpu.memory_space<vmem>>) attributes {dimension_semantics = [#tpu.dimension_semantics<parallel>], iteration_bounds = array<i64: 1>, scalar_prefetch = 0 : i64, scratch_operands = 0 : i64, tpu.core_type = #tpu.core_type<tc>, window_params = [{transform_indices = @transform_0, window_bounds = array<i64: 8, 896>}, {pipeline_mode = #tpu.pipeline_mode<synchronous>, transform_indices = @transform_1, window_bounds = array<i64: 896, 512>}, {pipeline_mode = #tpu.pipeline_mode<synchronous>, transform_indices = @transform_2, window_bounds = array<i64: 1, 512>}, {pipeline_mode = #tpu.pipeline_mode<synchronous>, transform_indices = @transform_3, window_bounds = array<i64: 512, 128>}, {pipeline_mode = #tpu.pipeline_mode<synchronous>, transform_indices = @transform_4, window_bounds = array<i64: 1, 128>}, {pipeline_mode = #tpu.pipeline_mode<synchronous>, transform_indices = @transform_5, window_bounds = array<i64: 128, 128>}, {pipeline_mode = #tpu.pipeline_mode<synchronous>, transform_indices = @transform_6, window_bounds = array<i64: 1, 128>}, {transform_indices = @transform_7, window_bounds = array<i64: 8, 128>}]} {
    %c0 = arith.constant 0 : index
    %c0_0 = arith.constant 0 : index
    %0 = vector.load %arg1[%c0, %c0_0] : memref<8x896xf32, #tpu.memory_space<vmem>>, vector<8x896xf32>
    %1 = arith.mulf %0, %0 : vector<8x896xf32>
    %2 = arith.addf %0, %1 : vector<8x896xf32>
    %3 = arith.mulf %1, %0 : vector<8x896xf32>
    %4 = arith.addf %2, %3 : vector<8x896xf32>
    %c0_1 = arith.constant 0 : index
    %c0_2 = arith.constant 0 : index
    %5 = vector.load %arg2[%c0_1, %c0_2] : memref<896x512xf32, #tpu.memory_space<vmem>>, vector<896x512xf32>
    %cst = arith.constant dense<0.000000e+00> : vector<8x512xf32>
    %6 = tpu.matmul %4, %5, %cst {dimension_numbers = #tpu.dot_dimension_numbers<[1], [0], [0], [1], [0, 0, 1, 1], [], []>} : vector<8x896xf32>, vector<896x512xf32>, vector<8x512xf32> -> vector<8x512xf32>
    %c0_3 = arith.constant 0 : index
    %c0_4 = arith.constant 0 : index
    %7 = vector.load %arg3[%c0_3, %c0_4] : memref<1x512xf32, #tpu.memory_space<vmem>>, vector<1x512xf32>
    %8 = vector.broadcast %7 : vector<1x512xf32> to vector<8x512xf32>
    %9 = arith.addf %6, %8 : vector<8x512xf32>
    %10 = arith.mulf %9, %9 : vector<8x512xf32>
    %11 = arith.addf %9, %10 : vector<8x512xf32>
    %12 = arith.mulf %10, %9 : vector<8x512xf32>
    %13 = arith.addf %11, %12 : vector<8x512xf32>
    %c0_5 = arith.constant 0 : index
    %c0_6 = arith.constant 0 : index
    %14 = vector.load %arg4[%c0_5, %c0_6] : memref<512x128xf32, #tpu.memory_space<vmem>>, vector<512x128xf32>
    %cst_7 = arith.constant dense<0.000000e+00> : vector<8x128xf32>
    %15 = tpu.matmul %13, %14, %cst_7 {dimension_numbers = #tpu.dot_dimension_numbers<[1], [0], [0], [1], [0, 0, 1, 1], [], []>} : vector<8x512xf32>, vector<512x128xf32>, vector<8x128xf32> -> vector<8x128xf32>
    %c0_8 = arith.constant 0 : index
    %c0_9 = arith.constant 0 : index
    %16 = vector.load %arg5[%c0_8, %c0_9] : memref<1x128xf32, #tpu.memory_space<vmem>>, vector<1x128xf32>
    %17 = vector.broadcast %16 : vector<1x128xf32> to vector<8x128xf32>
    %18 = arith.addf %15, %17 : vector<8x128xf32>
    %19 = arith.mulf %18, %18 : vector<8x128xf32>
    %20 = arith.addf %18, %19 : vector<8x128xf32>
    %21 = arith.mulf %19, %18 : vector<8x128xf32>
    %22 = arith.addf %20, %21 : vector<8x128xf32>
    %c0_10 = arith.constant 0 : index
    %c0_11 = arith.constant 0 : index
    %23 = vector.load %arg6[%c0_10, %c0_11] : memref<128x128xf32, #tpu.memory_space<vmem>>, vector<128x128xf32>
    %cst_12 = arith.constant dense<0.000000e+00> : vector<8x128xf32>
    %24 = tpu.matmul %22, %23, %cst_12 {dimension_numbers = #tpu.dot_dimension_numbers<[1], [0], [0], [1], [0, 0, 1, 1], [], []>} : vector<8x128xf32>, vector<128x128xf32>, vector<8x128xf32> -> vector<8x128xf32>
    %c0_13 = arith.constant 0 : index
    %c0_14 = arith.constant 0 : index
    %25 = vector.load %arg7[%c0_13, %c0_14] : memref<1x128xf32, #tpu.memory_space<vmem>>, vector<1x128xf32>
    %26 = vector.broadcast %25 : vector<1x128xf32> to vector<8x128xf32>
    %27 = arith.addf %24, %26 : vector<8x128xf32>
    %c0_15 = arith.constant 0 : index
    %c0_16 = arith.constant 0 : index
    %28 = vector.load %arg8[%c0_15, %c0_16] : memref<8x128xf32, #tpu.memory_space<vmem>>, vector<8x128xf32>
    tpu.vector_store %arg8[%c0_15, %c0_16], %27 {strides = array<i32>} : memref<8x128xf32, #tpu.memory_space<vmem>>, vector<8x128xf32>,
    return
  }
  func.func @transform_0(%arg0: i32) -> (i32, i32) {
    %c0_i32 = arith.constant 0 : i32
    %c0_i32_0 = arith.constant 0 : i32
    return %arg0, %c0_i32 : i32, i32
  }
  func.func @transform_1(%arg0: i32) -> (i32, i32) {
    %c0_i32 = arith.constant 0 : i32
    %c0_i32_0 = arith.constant 0 : i32
    %c0_i32_1 = arith.constant 0 : i32
    return %c0_i32, %c0_i32_0 : i32, i32
  }
  func.func @transform_2(%arg0: i32) -> (i32, i32) {
    %c0_i32 = arith.constant 0 : i32
    %c0_i32_0 = arith.constant 0 : i32
    %c0_i32_1 = arith.constant 0 : i32
    return %c0_i32, %c0_i32_0 : i32, i32
  }
  func.func @transform_3(%arg0: i32) -> (i32, i32) {
    %c0_i32 = arith.constant 0 : i32
    %c0_i32_0 = arith.constant 0 : i32
    %c0_i32_1 = arith.constant 0 : i32
    return %c0_i32, %c0_i32_0 : i32, i32
  }
  func.func @transform_4(%arg0: i32) -> (i32, i32) {
    %c0_i32 = arith.constant 0 : i32
    %c0_i32_0 = arith.constant 0 : i32
    %c0_i32_1 = arith.constant 0 : i32
    return %c0_i32, %c0_i32_0 : i32, i32
  }
  func.func @transform_5(%arg0: i32) -> (i32, i32) {
    %c0_i32 = arith.constant 0 : i32
    %c0_i32_0 = arith.constant 0 : i32
    %c0_i32_1 = arith.constant 0 : i32
    return %c0_i32, %c0_i32_0 : i32, i32
  }
  func.func @transform_6(%arg0: i32) -> (i32, i32) {
    %c0_i32 = arith.constant 0 : i32
    %c0_i32_0 = arith.constant 0 : i32
    %c0_i32_1 = arith.constant 0 : i32
    return %c0_i32, %c0_i32_0 : i32, i32
  }
  func.func @transform_7(%arg0: i32) -> (i32, i32) {
    %c0_i32 = arith.constant 0 : i32
    %c0_i32_0 = arith.constant 0 : i32
    return %arg0, %c0_i32 : i32, i32
  }
}

</mosaic_0001>

<bundles_post_ra>
// kernel: tpu_custom_call.1
= control target key start
LH: loop header
LB: loop body
LE: loop exit
PB: predicated region body
PF: predicated region fallthrough
CT: control target
= control target key end

     0   :  { %12 = vsyncpa [#allocation3], 0  ;;  %s2569_s0 = inlined_call_operand.hbm [shape: f32[8,896], index: 0, kind: input, shape index: {}]   ;;  %s2570_s1 = inlined_call_operand.hbm [shape: f32[896,512], index: 1, kind: input, shape index: {}]   ;;  %s2571_s2 = inlined_call_operand.hbm [shape: f32[1,512], index: 2, kind: input, shape index: {}]   ;;  %s2572_s3 = inlined_call_operand.hbm [shape: f32[512,128], index: 3, kind: input, shape index: {}]   ;;  %s2573_s4 = inlined_call_operand.hbm [shape: f32[1,128], index: 4, kind: input, shape index: {}]   ;;  %s2574_s5 = inlined_call_operand.hbm [shape: f32[128,128], index: 5, kind: input, shape index: {}]   ;;  %s2575_s6 = inlined_call_operand.hbm [shape: f32[1,128], index: 6, kind: input, shape index: {}]   ;;  %s2576_s7 = inlined_call_operand.hbm [shape: f32[8,128], index: 7, kind: output, shape index: {}]  }
   0x1   :  { %13 = vsyncpa [#allocation6], 0 }
   0x2   :  { %14 = vsyncpa [#allocation9], 0 }
   0x3   :  { %15 = vsyncpa [#allocation12], 0 }
   0x4   :  { %16 = vsyncpa [#allocation4], 0  ;;  %s2407_s24 = smov [#allocation5]   ;;  %s2221_s28 = scalar_lea.hbm %s2570_s1, 57344 }
   0x5   :  { %s32_s25 = sshll.u32 %s2407_s24, 4  ;;  %p2222_p0 = scmp.ne.s32.totalorder %s2570_s1, %s2221_s28  ;;  %s33_s25 = int_to_ptr.vmem [resolvable:$true] %s32_s25 }
   0x6   :  { %p2225_p1 = scmp.lt.u32.totalorder %s2221_s28, %s2570_s1 }
   0x8   :  { %p2227_p2 = pnand %p2225_p1, %p2222_p0 }
   0xa   :  { %2230 = shalt.err (!%p2227_p2)
}
   0xb   :  { %s2231_s10 = scalar_lea.vmem %s33_s25, 57344  ;;  %p2236_p4 = scmp.lt.s32.totalorder %s33_s25, %s33_s25 }
   0xc   :  { %p2232_p3 = scmp.ne.s32.totalorder %s33_s25, %s2231_s10  ;;  %p2237_p5 = scmp.lt.s32.totalorder %s2231_s10, %s2231_s10 }
   0xe   :  { %p2238_p6 = por %p2237_p5, %p2236_p4 }
  0x10   :  { %p2239_p7 = pnand %p2238_p6, %p2232_p3 }
  0x12   :  { %2242 = shalt.err (!%p2239_p7)
}
  0x13   :  { %s2408_s11 = smov 512   ;;  %s2409_s12 = smov 32  }
  0x14   :  { %38 = dma.hbm_to_vmem [thread:$0]  %s2570_s1, 57344, %s33_s25, [#allocation6], %s2408_s11, %s2408_s11, %s2409_s12  }
  0x15   :  { %s2410_s15 = smov [#allocation8]   ;;  %s2243_s19 = scalar_lea.hbm %s2572_s3, 8192 }
  0x16   :  { %s54_s16 = sshll.u32 %s2410_s15, 4  ;;  %p2244_p8 = scmp.ne.s32.totalorder %s2572_s3, %s2243_s19  ;;  %s55_s16 = int_to_ptr.vmem [resolvable:$true] %s54_s16 }
  0x17   :  { %p2247_p9 = scmp.lt.u32.totalorder %s2243_s19, %s2572_s3 }
  0x19   :  { %p2249_p10 = pnand %p2247_p9, %p2244_p8 }
  0x1b   :  { %2252 = shalt.err (!%p2249_p10)
}
  0x1c   :  { %s2253_s24 = scalar_lea.vmem %s55_s16, 8192  ;;  %p2258_p12 = scmp.lt.s32.totalorder %s55_s16, %s55_s16 }
  0x1d   :  { %p2254_p11 = scmp.ne.s32.totalorder %s55_s16, %s2253_s24  ;;  %p2259_p13 = scmp.lt.s32.totalorder %s2253_s24, %s2253_s24 }
  0x1f   :  { %p2260_p0 = por %p2259_p13, %p2258_p12 }
  0x21   :  { %p2261_p1 = pnand %p2260_p0, %p2254_p11 }
  0x23   :  { %2264 = shalt.err (!%p2261_p1)
}
  0x24   :  { %s2411_s1 = smov 128   ;;  %s2412_s25 = smov 8  }
  0x25   :  { %60 = dma.hbm_to_vmem [thread:$0]  %s2572_s3, 8192, %s55_s16, [#allocation9], %s2411_s1, %s2411_s1, %s2412_s25  }
  0x26   :  { %s2413_s28 = smov [#allocation11]   ;;  %s2414_s30 = smov [#allocation2]  }
  0x27   :  { %s76_s29 = sshll.u32 %s2413_s28, 4  ;;  %s23_s8 = sshll.u32 %s2414_s30, 4  ;;  %s77_s29 = int_to_ptr.vmem [resolvable:$true] %s76_s29  ;;  %s24_s8 = int_to_ptr.vmem [resolvable:$true] %s23_s8 }
  0x28   :  { %s2265_s11 = scalar_lea.hbm %s2574_s5, 2048 }
  0x29   :  { %p2266_p2 = scmp.ne.s32.totalorder %s2574_s5, %s2265_s11  ;;  %p2269_p3 = scmp.lt.u32.totalorder %s2265_s11, %s2574_s5 }
  0x2b   :  { %p2271_p4 = pnand %p2269_p3, %p2266_p2 }
  0x2d   :  { %2274 = shalt.err (!%p2271_p4)
}
  0x2e   :  { %s2275_s3 = scalar_lea.vmem %s77_s29, 2048  ;;  %p2280_p6 = scmp.lt.s32.totalorder %s77_s29, %s77_s29 }
  0x2f   :  { %p2276_p5 = scmp.ne.s32.totalorder %s77_s29, %s2275_s3  ;;  %p2281_p7 = scmp.lt.s32.totalorder %s2275_s3, %s2275_s3 }
  0x31   :  { %p2282_p8 = por %p2281_p7, %p2280_p6 }
  0x33   :  { %p2283_p9 = pnand %p2282_p8, %p2276_p5 }
  0x35   :  { %2286 = shalt.err (!%p2283_p9)
}
  0x36   :  { %82 = dma.hbm_to_vmem [thread:$0]  %s2574_s5, 2048, %s77_s29, [#allocation12], %s2411_s1, %s2411_s1, %s2412_s25  }
  0x37   :  { %s2287_s20 = scalar_lea.hbm %s2569_s0, 896 }
  0x38   :  { %p2288_p10 = scmp.ne.s32.totalorder %s2569_s0, %s2287_s20  ;;  %p2291_p11 = scmp.lt.u32.totalorder %s2287_s20, %s2569_s0 }
  0x3a   :  { %p2293_p12 = pnand %p2291_p11, %p2288_p10 }
  0x3c   :  { %2296 = shalt.err (!%p2293_p12)
}
  0x3d   :  { %s2297_s26 = scalar_lea.vmem %s24_s8, 896  ;;  %p2302_p0 = scmp.lt.s32.totalorder %s24_s8, %s24_s8 }
  0x3e   :  { %p2298_p13 = scmp.ne.s32.totalorder %s24_s8, %s2297_s26  ;;  %p2303_p1 = scmp.lt.s32.totalorder %s2297_s26, %s2297_s26 }
  0x40   :  { %p2304_p2 = por %p2303_p1, %p2302_p0 }
  0x42   :  { %p2305_p3 = pnand %p2304_p2, %p2298_p13 }
  0x44   :  { %2308 = shalt.err (!%p2305_p3)
}
  0x45   :  { %26 = dma.hbm_to_vmem [thread:$0]  %s2569_s0, 896, %s24_s8, [#allocation3]  }
  0x46   :  { %s2415_s25 = smov [#allocation7]   ;;  %s2416_s28 = smov [#allocation10]  }
  0x47   :  { %s45_s27 = sshll.u32 %s2415_s25, 4  ;;  %s67_s29 = sshll.u32 %s2416_s28, 4  ;;  %s46_s27 = int_to_ptr.vmem [resolvable:$true] %s45_s27  ;;  %s68_s29 = int_to_ptr.vmem [resolvable:$true] %s67_s29 }
  0x48   :  { %s2309_s10 = scalar_lea.hbm %s2571_s2, 64 }
  0x49   :  { %p2310_p4 = scmp.ne.s32.totalorder %s2571_s2, %s2309_s10  ;;  %p2313_p5 = scmp.lt.u32.totalorder %s2309_s10, %s2571_s2 }
  0x4b   :  { %p2315_p6 = pnand %p2313_p5, %p2310_p4 }
  0x4d   :  { %2318 = shalt.err (!%p2315_p6)
}
  0x4e   :  { %s2319_s0 = scalar_lea.vmem %s46_s27, 64  ;;  %p2324_p8 = scmp.lt.s32.totalorder %s46_s27, %s46_s27 }
  0x4f   :  { %p2320_p7 = scmp.ne.s32.totalorder %s46_s27, %s2319_s0  ;;  %p2325_p9 = scmp.lt.s32.totalorder %s2319_s0, %s2319_s0 }
  0x51   :  { %p2326_p10 = por %p2325_p9, %p2324_p8 }
  0x53   :  { %p2327_p11 = pnand %p2326_p10, %p2320_p7 }
  0x55   :  { %2330 = shalt.err (!%p2327_p11)
}
  0x56   :  { %48 = dma.hbm_to_vmem [thread:$0]  %s2571_s2, 64, %s46_s27, [#allocation6]  }
  0x57   :  { %s2331_s17 = scalar_lea.hbm %s2573_s4, 16 }
  0x58   :  { %p2332_p12 = scmp.ne.s32.totalorder %s2573_s4, %s2331_s17  ;;  %p2335_p13 = scmp.lt.u32.totalorder %s2331_s17, %s2573_s4 }
  0x5a   :  { %p2337_p0 = pnand %p2335_p13, %p2332_p12 }
  0x5c   :  { %2340 = shalt.err (!%p2337_p0)
}
  0x5d   :  { %s2341_s22 = scalar_lea.vmem %s68_s29, 16  ;;  %s2345_s23 = scalar_lea.vmem %s68_s29, 32 }
  0x5e   :  { %p2342_p1 = scmp.ne.s32.totalorder %s68_s29, %s2341_s22  ;;  %p2346_p2 = scmp.lt.s32.totalorder %s68_s29, %s68_s29 }
  0x5f   :  { %p2347_p3 = scmp.lt.s32.totalorder %s2345_s23, %s2341_s22 }
  0x61   :  { %p2348_p4 = por %p2347_p3, %p2346_p2 }
  0x63   :  { %p2349_p5 = pnand %p2348_p4, %p2342_p1 }
  0x65   :  { %2352 = shalt.err (!%p2349_p5)
}
  0x66   :  { %70 = dma.hbm_to_vmem [thread:$0]  %s2573_s4, 16, %s68_s29, [#allocation9]  }
  0x67   :  { %s2417_s26 = smov [#allocation13]   ;;  %s2353_s27 = scalar_lea.hbm %s2575_s6, 16 }
  0x68   :  { %s89_s5 = sshll.u32 %s2417_s26, 4  ;;  %p2354_p6 = scmp.ne.s32.totalorder %s2575_s6, %s2353_s27  ;;  %s90_s5 = int_to_ptr.vmem [resolvable:$true] %s89_s5 }
  0x69   :  { %p2357_p7 = scmp.lt.u32.totalorder %s2353_s27, %s2575_s6 }
  0x6b   :  { %p2359_p8 = pnand %p2357_p7, %p2354_p6 }
  0x6d   :  { %2362 = shalt.err (!%p2359_p8)
}
  0x6e   :  { %s2363_s11 = scalar_lea.vmem %s90_s5, 16  ;;  %s2367_s4 = scalar_lea.vmem %s90_s5, 32 }
  0x6f   :  { %p2364_p9 = scmp.ne.s32.totalorder %s90_s5, %s2363_s11  ;;  %p2368_p10 = scmp.lt.s32.totalorder %s90_s5, %s90_s5 }
  0x70   :  { %p2369_p11 = scmp.lt.s32.totalorder %s2367_s4, %s2363_s11 }
  0x72   :  { %p2370_p12 = por %p2369_p11, %p2368_p10 }
  0x74   :  { %p2371_p13 = pnand %p2370_p12, %p2364_p9 }
  0x76   :  { %2374 = shalt.err (!%p2371_p13)
}
  0x77   :  { %92 = dma.hbm_to_vmem [thread:$0]  %s2575_s6, 16, %s90_s5, [#allocation12]  }
  0x78   :  { %2397 = dma.done.wait [#allocation3], 896  }
  0x79   :  { %2398 = vsyncadd [#allocation3], 4294966400 }
  0x7a   :  { %2399 = dma.done.wait [#allocation6], 57408  }
  0x7b   :  { %2400 = vsyncadd [#allocation6], 4294909888 }
  0x7c   :  { %2401 = dma.done.wait [#allocation9], 8208  }
  0x7d   :  { %2402 = vsyncadd [#allocation9], 4294959088 }
  0x7e   :  { %2403 = dma.done.wait [#allocation12], 2064  }
  0x7f   :  { %2404 = vsyncadd [#allocation12], 4294965232  ;;  %v150_v0 = vld [vmem:[#allocation5 + $0x8] sm:$0xff]  ;;  %v152_v2 = vld [vmem:[#allocation5 + $0x18] sm:$0xff]  ;;  %vm2420_vm0 = vmmov 0   ;;  %s2421_s6 = smov [#allocation14]  }
  0x80   :  { %v154_v1 = vld [vmem:[#allocation5 + $0x28] sm:$0xff]  ;;  %v156_v4 = vld [vmem:[#allocation5 + $0x38] sm:$0xff]  ;;  %v149_v5 = vld [vmem:[#allocation5] sm:$0xff]  ;;  %s1518_s13 = sshll.u32 %s2421_s6, 4  ;;  %s1519_s13 = int_to_ptr.vmem [resolvable:$true] %s1518_s13 }
  0x81   :  { %v1654_v3 = vpack.c.bf16 %v154_v1, %v150_v0  ;;  %v153_v6 = vld [vmem:[#allocation5 + $0x20] sm:$0xff]  ;;  %v1878_v7 = vpack.c.bf16 %v156_v4, %v152_v2  ;;  %v151_v9 = vld [vmem:[#allocation5 + $0x10] sm:$0xff]  ;;  %v158_v11 = vld [vmem:[#allocation5 + $0x48] sm:$0xff]  ;;  %s2375_s14 = scalar_lea.vmem %s1519_s13, 128  ;;  %p2380_p1 = scmp.lt.s32.totalorder %s1519_s13, %s1519_s13 }
  0x82   :  { %v1656_v8 = vpack.c.bf16 %v153_v6, %v149_v5  ;;  %v155_v10 = vld [vmem:[#allocation5 + $0x30] sm:$0xff]  ;;  %v162_v13 = vld [vmem:[#allocation5 + $0x68] sm:$0xff]  ;;  %v160_v14 = vld [vmem:[#allocation5 + $0x58] sm:$0xff]  ;;  %p2376_p0 = scmp.ne.s32.totalorder %s1519_s13, %s2375_s14  ;;  %p2381_p2 = scmp.lt.s32.totalorder %s2375_s14, %s2375_s14 }
  0x83   :  { %1655 = vmatprep.subr.bf16.mxu0 %v1654_v3  ;;  %v1880_v12 = vpack.c.bf16 %v155_v10, %v151_v9  ;;  %v164_v15 = vld [vmem:[#allocation5 + $0x78] sm:$0xff]  ;;  %1879 = vmatprep.subr.bf16.mxu1 %v1878_v7  ;;  %v1658_v16 = vpack.c.bf16 %v162_v13, %v158_v11  ;;  %v157_v18 = vld [vmem:[#allocation5 + $0x40] sm:$0xff]  ;;  %v159_v20 = vld [vmem:[#allocation5 + $0x50] sm:$0xff] }
  0x84   :  { %1657 = vmatpush1.bf16.msra.mxu0 %v1656_v8  ;;  %v1882_v17 = vpack.c.bf16 %v164_v15, %v160_v14  ;;  %v161_v19 = vld [vmem:[#allocation5 + $0x60] sm:$0xff]  ;;  %v163_v22 = vld [vmem:[#allocation5 + $0x70] sm:$0xff]  ;;  %v166_v23 = vld [vmem:[#allocation5 + $0x88] sm:$0xff]  ;;  %p2382_p3 = por %p2381_p2, %p2380_p1 }
  0x85   :  { %1881 = vmatpush1.bf16.msra.mxu1 %v1880_v12  ;;  %v1660_v21 = vpack.c.bf16 %v161_v19, %v157_v18  ;;  %v170_v24 = vld [vmem:[#allocation5 + $0xa8] sm:$0xff]  ;;  %1659 = vmatprep.subr.bf16.mxu0 %v1658_v16  ;;  %v1884_v25 = vpack.c.bf16 %v163_v22, %v159_v20  ;;  %v168_v27 = vld [vmem:[#allocation5 + $0x98] sm:$0xff]  ;;  %v165_v29 = vld [vmem:[#allocation5 + $0x80] sm:$0xff] }
  0x86   :  { %1883 = vmatprep.subr.bf16.mxu1 %v1882_v17  ;;  %v1662_v26 = vpack.c.bf16 %v170_v24, %v166_v23  ;;  %v172_v28 = vld [vmem:[#allocation5 + $0xb8] sm:$0xff]  ;;  %v169_v31 = vld [vmem:[#allocation5 + $0xa0] sm:$0xff]  ;;  %v167_v32 = vld [vmem:[#allocation5 + $0x90] sm:$0xff]  ;;  %p2383_p4 = pnand %p2382_p3, %p2376_p0 }
  0x87   :  { %v1886_v30 = vpack.c.bf16 %v172_v28, %v168_v27  ;;  %v171_v33 = vld [vmem:[#allocation5 + $0xb0] sm:$0xff]  ;;  %v1664_v34 = vpack.c.bf16 %v169_v31, %v165_v29  ;;  %v174_v35 = vld [vmem:[#allocation5 + $0xc8] sm:$0xff]  ;;  %v176_v37 = vld [vmem:[#allocation5 + $0xd8] sm:$0xff] }
  0x88   :  { %1661 = vmatpush1.bf16.msra.mxu0 %v1660_v21  ;;  %v178_v36 = vld [vmem:[#allocation5 + $0xe8] sm:$0xff]  ;;  %v1888_v38 = vpack.c.bf16 %v171_v33, %v167_v32  ;;  %v180_v40 = vld [vmem:[#allocation5 + $0xf8] sm:$0xff]  ;;  %v173_v41 = vld [vmem:[#allocation5 + $0xc0] sm:$0xff] }
  0x89   :  { %1885 = vmatpush1.bf16.msra.mxu1 %v1884_v25  ;;  %1663 = vmatprep.subr.bf16.mxu0 %v1662_v26  ;;  %v1666_v39 = vpack.c.bf16 %v178_v36, %v174_v35  ;;  %v177_v42 = vld [vmem:[#allocation5 + $0xe0] sm:$0xff]  ;;  %v1890_v43 = vpack.c.bf16 %v180_v40, %v176_v37  ;;  %v175_v44 = vld [vmem:[#allocation5 + $0xd0] sm:$0xff]  ;;  %v182_v46 = vld [vmem:[#allocation5 + $0x108] sm:$0xff] }
  0x8a   :  { %1887 = vmatprep.subr.bf16.mxu1 %v1886_v30  ;;  %v179_v45 = vld [vmem:[#allocation5 + $0xf0] sm:$0xff]  ;;  %v186_v47 = vld [vmem:[#allocation5 + $0x128] sm:$0xff]  ;;  %v184_v48 = vld [vmem:[#allocation5 + $0x118] sm:$0xff]  ;;  %v1668_v50 = vpack.c.bf16 %v177_v42, %v173_v41 }
  0x8b   :  { %v188_v49 = vld [vmem:[#allocation5 + $0x138] sm:$0xff]  ;;  %v1892_v51 = vpack.c.bf16 %v179_v45, %v175_v44  ;;  %v1670_v52 = vpack.c.bf16 %v186_v47, %v182_v46  ;;  %v181_v53 = vld [vmem:[#allocation5 + $0x100] sm:$0xff]  ;;  %v183_v55 = vld [vmem:[#allocation5 + $0x110] sm:$0xff] }
  0x8c   :  { %1665 = vmatpush1.bf16.msra.mxu0 %v1664_v34  ;;  %v185_v54 = vld [vmem:[#allocation5 + $0x120] sm:$0xff]  ;;  %v1894_v56 = vpack.c.bf16 %v188_v49, %v184_v48  ;;  %v187_v57 = vld [vmem:[#allocation5 + $0x130] sm:$0xff]  ;;  %v190_v58 = vld [vmem:[#allocation5 + $0x148] sm:$0xff] }
  0x8d   :  { %1889 = vmatpush1.bf16.msra.mxu1 %v1888_v38  ;;  %1667 = vmatprep.subr.bf16.mxu0 %v1666_v39  ;;  %v194_v59 = vld [vmem:[#allocation5 + $0x168] sm:$0xff]  ;;  %v192_v60 = vld [vmem:[#allocation5 + $0x158] sm:$0xff]  ;;  %v1672_v62 = vpack.c.bf16 %v185_v54, %v181_v53  ;;  %v1896_v63 = vpack.c.bf16 %v187_v57, %v183_v55  ;;  %v189_v1 = vld [vmem:[#allocation5 + $0x140] sm:$0xff] }
  0x8e   :  { %1891 = vmatprep.subr.bf16.mxu1 %v1890_v43  ;;  %v196_v61 = vld [vmem:[#allocation5 + $0x178] sm:$0xff]  ;;  %v1674_v0 = vpack.c.bf16 %v194_v59, %v190_v58  ;;  %v193_v2 = vld [vmem:[#allocation5 + $0x160] sm:$0xff]  ;;  %v191_v3 = vld [vmem:[#allocation5 + $0x150] sm:$0xff] }
  0x8f   :  { %v1898_v4 = vpack.c.bf16 %v196_v61, %v192_v60  ;;  %v195_v5 = vld [vmem:[#allocation5 + $0x170] sm:$0xff]  ;;  %v198_v6 = vld [vmem:[#allocation5 + $0x188] sm:$0xff]  ;;  %v200_v8 = vld [vmem:[#allocation5 + $0x198] sm:$0xff]  ;;  %v1676_v10 = vpack.c.bf16 %v193_v2, %v189_v1 }
  0x90   :  { %1669 = vmatpush1.bf16.msra.mxu0 %v1668_v50  ;;  %v202_v7 = vld [vmem:[#allocation5 + $0x1a8] sm:$0xff]  ;;  %v204_v9 = vld [vmem:[#allocation5 + $0x1b8] sm:$0xff]  ;;  %v1900_v11 = vpack.c.bf16 %v195_v5, %v191_v3  ;;  %v197_v13 = vld [vmem:[#allocation5 + $0x180] sm:$0xff] }
  0x91   :  { %1893 = vmatpush1.bf16.msra.mxu1 %v1892_v51  ;;  %1671 = vmatprep.subr.bf16.mxu0 %v1670_v52  ;;  %v1678_v12 = vpack.c.bf16 %v202_v7, %v198_v6  ;;  %v201_v14 = vld [vmem:[#allocation5 + $0x1a0] sm:$0xff]  ;;  %v199_v15 = vld [vmem:[#allocation5 + $0x190] sm:$0xff]  ;;  %v1902_v16 = vpack.c.bf16 %v204_v9, %v200_v8  ;;  %v206_v18 = vld [vmem:[#allocation5 + $0x1c8] sm:$0xff] }
  0x92   :  { %1895 = vmatprep.subr.bf16.mxu1 %v1894_v56  ;;  %v203_v17 = vld [vmem:[#allocation5 + $0x1b0] sm:$0xff]  ;;  %v210_v19 = vld [vmem:[#allocation5 + $0x1e8] sm:$0xff]  ;;  %v208_v20 = vld [vmem:[#allocation5 + $0x1d8] sm:$0xff]  ;;  %v1680_v22 = vpack.c.bf16 %v201_v14, %v197_v13 }
  0x93   :  { %v212_v21 = vld [vmem:[#allocation5 + $0x1f8] sm:$0xff]  ;;  %v1904_v23 = vpack.c.bf16 %v203_v17, %v199_v15  ;;  %v1682_v24 = vpack.c.bf16 %v210_v19, %v206_v18  ;;  %v205_v25 = vld [vmem:[#allocation5 + $0x1c0] sm:$0xff]  ;;  %v207_v27 = vld [vmem:[#allocation5 + $0x1d0] sm:$0xff] }
  0x94   :  { %1673 = vmatpush1.bf16.msra.mxu0 %v1672_v62  ;;  %v209_v26 = vld [vmem:[#allocation5 + $0x1e0] sm:$0xff]  ;;  %v1906_v28 = vpack.c.bf16 %v212_v21, %v208_v20  ;;  %v211_v29 = vld [vmem:[#allocation5 + $0x1f0] sm:$0xff]  ;;  %v214_v30 = vld [vmem:[#allocation5 + $0x208] sm:$0xff] }
  0x95   :  { %1897 = vmatpush1.bf16.msra.mxu1 %v1896_v63  ;;  %1675 = vmatprep.subr.bf16.mxu0 %v1674_v0  ;;  %v218_v31 = vld [vmem:[#allocation5 + $0x228] sm:$0xff]  ;;  %v216_v32 = vld [vmem:[#allocation5 + $0x218] sm:$0xff]  ;;  %v1684_v34 = vpack.c.bf16 %v209_v26, %v205_v25  ;;  %v1908_v35 = vpack.c.bf16 %v211_v29, %v207_v27  ;;  %v213_v37 = vld [vmem:[#allocation5 + $0x200] sm:$0xff] }
  0x96   :  { %1899 = vmatprep.subr.bf16.mxu1 %v1898_v4  ;;  %v220_v33 = vld [vmem:[#allocation5 + $0x238] sm:$0xff]  ;;  %v1686_v36 = vpack.c.bf16 %v218_v31, %v214_v30  ;;  %v217_v38 = vld [vmem:[#allocation5 + $0x220] sm:$0xff]  ;;  %v215_v39 = vld [vmem:[#allocation5 + $0x210] sm:$0xff] }
  0x97   :  { %v1910_v40 = vpack.c.bf16 %v220_v33, %v216_v32  ;;  %v219_v41 = vld [vmem:[#allocation5 + $0x230] sm:$0xff]  ;;  %v222_v42 = vld [vmem:[#allocation5 + $0x248] sm:$0xff]  ;;  %v224_v44 = vld [vmem:[#allocation5 + $0x258] sm:$0xff]  ;;  %v1688_v46 = vpack.c.bf16 %v217_v38, %v213_v37 }
  0x98   :  { %1677 = vmatpush1.bf16.msra.mxu0 %v1676_v10  ;;  %v226_v43 = vld [vmem:[#allocation5 + $0x268] sm:$0xff]  ;;  %v228_v45 = vld [vmem:[#allocation5 + $0x278] sm:$0xff]  ;;  %v1912_v47 = vpack.c.bf16 %v219_v41, %v215_v39  ;;  %v221_v49 = vld [vmem:[#allocation5 + $0x240] sm:$0xff] }
  0x99   :  { %1901 = vmatpush1.bf16.msra.mxu1 %v1900_v11  ;;  %1679 = vmatprep.subr.bf16.mxu0 %v1678_v12  ;;  %v1690_v48 = vpack.c.bf16 %v226_v43, %v222_v42  ;;  %v225_v50 = vld [vmem:[#allocation5 + $0x260] sm:$0xff]  ;;  %v223_v51 = vld [vmem:[#allocation5 + $0x250] sm:$0xff]  ;;  %v1914_v52 = vpack.c.bf16 %v228_v45, %v224_v44  ;;  %v230_v54 = vld [vmem:[#allocation5 + $0x288] sm:$0xff] }
  0x9a   :  { %1903 = vmatprep.subr.bf16.mxu1 %v1902_v16  ;;  %v227_v53 = vld [vmem:[#allocation5 + $0x270] sm:$0xff]  ;;  %v234_v55 = vld [vmem:[#allocation5 + $0x2a8] sm:$0xff]  ;;  %v232_v56 = vld [vmem:[#allocation5 + $0x298] sm:$0xff]  ;;  %v1692_v58 = vpack.c.bf16 %v225_v50, %v221_v49 }
  0x9b   :  { %v236_v57 = vld [vmem:[#allocation5 + $0x2b8] sm:$0xff]  ;;  %v1916_v59 = vpack.c.bf16 %v227_v53, %v223_v51  ;;  %v1694_v60 = vpack.c.bf16 %v234_v55, %v230_v54  ;;  %v229_v61 = vld [vmem:[#allocation5 + $0x280] sm:$0xff]  ;;  %v231_v63 = vld [vmem:[#allocation5 + $0x290] sm:$0xff] }
  0x9c   :  { %1681 = vmatpush1.bf16.msra.mxu0 %v1680_v22  ;;  %v233_v62 = vld [vmem:[#allocation5 + $0x2a0] sm:$0xff]  ;;  %v1918_v0 = vpack.c.bf16 %v236_v57, %v232_v56  ;;  %v235_v1 = vld [vmem:[#allocation5 + $0x2b0] sm:$0xff]  ;;  %v238_v2 = vld [vmem:[#allocation5 + $0x2c8] sm:$0xff] }
  0x9d   :  { %1905 = vmatpush1.bf16.msra.mxu1 %v1904_v23  ;;  %1683 = vmatprep.subr.bf16.mxu0 %v1682_v24  ;;  %v242_v3 = vld [vmem:[#allocation5 + $0x2e8] sm:$0xff]  ;;  %v240_v4 = vld [vmem:[#allocation5 + $0x2d8] sm:$0xff]  ;;  %v1696_v6 = vpack.c.bf16 %v233_v62, %v229_v61  ;;  %v237_v7 = vld [vmem:[#allocation5 + $0x2c0] sm:$0xff]  ;;  %v1920_v8 = vpack.c.bf16 %v235_v1, %v231_v63 }
  0x9e   :  { %1907 = vmatprep.subr.bf16.mxu1 %v1906_v28  ;;  %v244_v5 = vld [vmem:[#allocation5 + $0x2f8] sm:$0xff]  ;;  %v1698_v9 = vpack.c.bf16 %v242_v3, %v238_v2  ;;  %v241_v10 = vld [vmem:[#allocation5 + $0x2e0] sm:$0xff]  ;;  %v239_v11 = vld [vmem:[#allocation5 + $0x2d0] sm:$0xff] }
  0x9f   :  { %v243_v12 = vld [vmem:[#allocation5 + $0x2f0] sm:$0xff]  ;;  %v1922_v13 = vpack.c.bf16 %v244_v5, %v240_v4  ;;  %v246_v14 = vld [vmem:[#allocation5 + $0x308] sm:$0xff]  ;;  %v248_v17 = vld [vmem:[#allocation5 + $0x318] sm:$0xff]  ;;  %v1700_v20 = vpack.c.bf16 %v241_v10, %v237_v7 }
  0xa0   :  { %1685 = vmatpush1.bf16.msra.mxu0 %v1684_v34  ;;  %v250_v15 = vld [vmem:[#allocation5 + $0x328] sm:$0xff]  ;;  %v115_v16 = vld [vmem:[#allocation2 + $0x8] sm:$0xff]  ;;  %v252_v18 = vld [vmem:[#allocation5 + $0x338] sm:$0xff]  ;;  %v1924_v21 = vpack.c.bf16 %v243_v12, %v239_v11 }
  0xa1   :  { %1909 = vmatpush1.bf16.msra.mxu1 %v1908_v35  ;;  %1687 = vmatprep.subr.bf16.mxu0 %v1686_v36  ;;  %v122_v19 = vmul.f32 %v115_v16, %v115_v16  ;;  %v1702_v22 = vpack.c.bf16 %v250_v15, %v246_v14  ;;  %v245_v23 = vld [vmem:[#allocation5 + $0x300] sm:$0xff]  ;;  %v247_v25 = vld [vmem:[#allocation5 + $0x310] sm:$0xff]  ;;  %v1926_v28 = vpack.c.bf16 %v252_v18, %v248_v17  ;;  %v254_v30 = vld [vmem:[#allocation5 + $0x348] sm:$0xff] }
  0xa2   :  { %1911 = vmatprep.subr.bf16.mxu1 %v1910_v40  ;;  %v249_v24 = vld [vmem:[#allocation5 + $0x320] sm:$0xff]  ;;  %v251_v29 = vld [vmem:[#allocation5 + $0x330] sm:$0xff]  ;;  %v258_v31 = vld [vmem:[#allocation5 + $0x368] sm:$0xff] }
  0xa3   :  { %v129_v26 = vadd.f32 %v122_v19, %v115_v16  ;;  %v136_v27 = vmul.f32 %v122_v19, %v115_v16  ;;  %v256_v32 = vld [vmem:[#allocation5 + $0x358] sm:$0xff]  ;;  %v1704_v35 = vpack.c.bf16 %v249_v24, %v245_v23  ;;  %v1928_v36 = vpack.c.bf16 %v251_v29, %v247_v25  ;;  %v253_v38 = vld [vmem:[#allocation5 + $0x340] sm:$0xff]  ;;  %v255_v40 = vld [vmem:[#allocation5 + $0x350] sm:$0xff] }
  0xa4   :  { %1689 = vmatpush1.bf16.msra.mxu0 %v1688_v46  ;;  %v260_v33 = vld [vmem:[#allocation5 + $0x378] sm:$0xff]  ;;  %v1706_v37 = vpack.c.bf16 %v258_v31, %v254_v30  ;;  %v257_v39 = vld [vmem:[#allocation5 + $0x360] sm:$0xff]  ;;  %v259_v42 = vld [vmem:[#allocation5 + $0x370] sm:$0xff] }
  0xa5   :  { %1913 = vmatpush1.bf16.msra.mxu1 %v1912_v47  ;;  %1691 = vmatprep.subr.bf16.mxu0 %v1690_v48  ;;  %v143_v34 = vadd.f32 %v136_v27, %v129_v26  ;;  %v1930_v41 = vpack.c.bf16 %v260_v33, %v256_v32  ;;  %v262_v43 = vld [vmem:[#allocation5 + $0x388] sm:$0xff]  ;;  %v264_v45 = vld [vmem:[#allocation5 + $0x398] sm:$0xff]  ;;  %v1708_v47 = vpack.c.bf16 %v257_v39, %v253_v38  ;;  %v261_v51 = vld [vmem:[#allocation5 + $0x380] sm:$0xff] }
  0xa6   :  { %1915 = vmatprep.subr.bf16.mxu1 %v1914_v52  ;;  %v266_v44 = vld [vmem:[#allocation5 + $0x3a8] sm:$0xff]  ;;  %v268_v46 = vld [vmem:[#allocation5 + $0x3b8] sm:$0xff]  ;;  %v1932_v49 = vpack.c.bf16 %v259_v42, %v255_v40  ;;  %v265_v52 = vld [vmem:[#allocation5 + $0x3a0] sm:$0xff] }
  0xa7   :  { %683 = vmatprep.mubr.f32.mxu0 %v143_v34  ;;  %967 = vmatprep.mubr.f32.mxu1 %v143_v34  ;;  %v114_v48 = vld [vmem:[#allocation2] sm:$0xff]  ;;  %v1710_v50 = vpack.c.bf16 %v266_v44, %v262_v43  ;;  %v263_v53 = vld [vmem:[#allocation5 + $0x390] sm:$0xff]  ;;  %v1934_v54 = vpack.c.bf16 %v268_v46, %v264_v45  ;;  %v1712_v61 = vpack.c.bf16 %v265_v52, %v261_v51  ;;  %v273_v1 = vld [vmem:[#allocation5 + $0x3e0] sm:$0xff] }
  0xa8   :  { %1693 = vmatpush1.bf16.msra.mxu0 %v1692_v58  ;;  %v267_v55 = vld [vmem:[#allocation5 + $0x3b0] sm:$0xff]  ;;  %v270_v56 = vld [vmem:[#allocation5 + $0x3c8] sm:$0xff]  ;;  %v272_v58 = vld [vmem:[#allocation5 + $0x3d8] sm:$0xff] }
  0xa9   :  { %1917 = vmatpush1.bf16.msra.mxu1 %v1916_v59  ;;  %1695 = vmatprep.subr.bf16.mxu0 %v1694_v60  ;;  %v274_v57 = vld [vmem:[#allocation5 + $0x3e8] sm:$0xff]  ;;  %v276_v59 = vld [vmem:[#allocation5 + $0x3f8] sm:$0xff]  ;;  %v121_v60 = vmul.f32 %v114_v48, %v114_v48  ;;  %v1936_v62 = vpack.c.bf16 %v267_v55, %v263_v53  ;;  %v271_v2 = vld [vmem:[#allocation5 + $0x3d0] sm:$0xff] }
  0xaa   :  { %1919 = vmatprep.subr.bf16.mxu1 %v1918_v0  ;;  %v1714_v63 = vpack.c.bf16 %v274_v57, %v270_v56  ;;  %v269_v0 = vld [vmem:[#allocation5 + $0x3c0] sm:$0xff]  ;;  %v1938_v3 = vpack.c.bf16 %v276_v59, %v272_v58  ;;  %v275_v4 = vld [vmem:[#allocation5 + $0x3f0] sm:$0xff]  ;;  %v278_v5 = vld [vmem:[#allocation5 + $0x408] sm:$0xff] }
  0xab   :  { %v280_v7 = vld [vmem:[#allocation5 + $0x418] sm:$0xff]  ;;  %v135_v10 = vmul.f32 %v121_v60, %v114_v48  ;;  %v1716_v11 = vpack.c.bf16 %v273_v1, %v269_v0  ;;  %v1940_v12 = vpack.c.bf16 %v275_v4, %v271_v2  ;;  %v277_v14 = vld [vmem:[#allocation5 + $0x400] sm:$0xff]  ;;  %v279_v16 = vld [vmem:[#allocation5 + $0x410] sm:$0xff] }
  0xac   :  { %1697 = vmatpush1.bf16.msra.mxu0 %v1696_v6  ;;  %v282_v6 = vld [vmem:[#allocation5 + $0x428] sm:$0xff]  ;;  %v281_v15 = vld [vmem:[#allocation5 + $0x420] sm:$0xff]  ;;  %v283_v18 = vld [vmem:[#allocation5 + $0x430] sm:$0xff] }
  0xad   :  { %1921 = vmatpush1.bf16.msra.mxu1 %v1920_v8  ;;  %1699 = vmatprep.subr.bf16.mxu0 %v1698_v9  ;;  %v284_v8 = vld [vmem:[#allocation5 + $0x438] sm:$0xff]  ;;  %v128_v9 = vadd.f32 %v121_v60, %v114_v48  ;;  %v286_v19 = vld [vmem:[#allocation5 + $0x448] sm:$0xff]  ;;  %v1720_v24 = vpack.c.bf16 %v281_v15, %v277_v14  ;;  %v1944_v25 = vpack.c.bf16 %v283_v18, %v279_v16  ;;  %v285_v27 = vld [vmem:[#allocation5 + $0x440] sm:$0xff] }
  0xae   :  { %1923 = vmatprep.subr.bf16.mxu1 %v1922_v13  ;;  %v1718_v13 = vpack.c.bf16 %v282_v6, %v278_v5  ;;  %v1942_v17 = vpack.c.bf16 %v284_v8, %v280_v7  ;;  %v292_v23 = vld [vmem:[#allocation5 + $0x478] sm:$0xff]  ;;  %v287_v29 = vld [vmem:[#allocation5 + $0x450] sm:$0xff]  ;;  %v294_v32 = vld [vmem:[#allocation5 + $0x488] sm:$0xff] }
  0xaf   :  { %v291_v31 = vld [vmem:[#allocation5 + $0x470] sm:$0xff]  ;;  %v298_v33 = vld [vmem:[#allocation5 + $0x4a8] sm:$0xff]  ;;  %v296_v34 = vld [vmem:[#allocation5 + $0x498] sm:$0xff] }
  0xb0   :  { %1701 = vmatpush1.bf16.msra.mxu0 %v1700_v20  ;;  %v290_v20 = vld [vmem:[#allocation5 + $0x468] sm:$0xff]  ;;  %v1726_v38 = vpack.c.bf16 %v298_v33, %v294_v32  ;;  %v293_v39 = vld [vmem:[#allocation5 + $0x480] sm:$0xff]  ;;  %v299_v43 = vld [vmem:[#allocation5 + $0x4b0] sm:$0xff] }
  0xb1   :  { %1925 = vmatpush1.bf16.msra.mxu1 %v1924_v21  ;;  %1703 = vmatprep.subr.bf16.mxu0 %v1702_v22  ;;  %v142_v21 = vadd.f32 %v135_v10, %v128_v9  ;;  %v288_v22 = vld [vmem:[#allocation5 + $0x458] sm:$0xff]  ;;  %v1722_v26 = vpack.c.bf16 %v290_v20, %v286_v19  ;;  %v297_v40 = vld [vmem:[#allocation5 + $0x4a0] sm:$0xff]  ;;  %v302_v44 = vld [vmem:[#allocation5 + $0x4c8] sm:$0xff] }
  0xb2   :  { %1927 = vmatprep.subr.bf16.mxu1 %v1926_v28  ;;  %v289_v28 = vld [vmem:[#allocation5 + $0x460] sm:$0xff]  ;;  %v1946_v30 = vpack.c.bf16 %v292_v23, %v288_v22  ;;  %v306_v45 = vld [vmem:[#allocation5 + $0x4e8] sm:$0xff]  ;;  %v304_v46 = vld [vmem:[#allocation5 + $0x4d8] sm:$0xff]  ;;  %v1728_v48 = vpack.c.bf16 %v297_v40, %v293_v39 }
  0xb3   :  { %v301_v51 = vld [vmem:[#allocation5 + $0x4c0] sm:$0xff]  ;;  %v303_v53 = vld [vmem:[#allocation5 + $0x4d0] sm:$0xff]  ;;  %v310_v56 = vld [vmem:[#allocation5 + $0x508] sm:$0xff] }
  0xb4   :  { %1705 = vmatpush1.bf16.msra.mxu0 %v1704_v35  ;;  %v300_v35 = vld [vmem:[#allocation5 + $0x4b8] sm:$0xff]  ;;  %v305_v52 = vld [vmem:[#allocation5 + $0x4e0] sm:$0xff]  ;;  %v307_v55 = vld [vmem:[#allocation5 + $0x4f0] sm:$0xff] }
  0xb5   :  { %1929 = vmatpush1.bf16.msra.mxu1 %v1928_v36  ;;  %1707 = vmatprep.subr.bf16.mxu0 %v1706_v37  ;;  %v1724_v36 = vpack.c.bf16 %v289_v28, %v285_v27  ;;  %v1948_v37 = vpack.c.bf16 %v291_v31, %v287_v29  ;;  %v1950_v42 = vpack.c.bf16 %v300_v35, %v296_v34  ;;  %v314_v57 = vld [vmem:[#allocation5 + $0x528] sm:$0xff]  ;;  %v312_v58 = vld [vmem:[#allocation5 + $0x518] sm:$0xff]  ;;  %v313_v0 = vld [vmem:[#allocation5 + $0x520] sm:$0xff] }
  0xb6   :  { %1931 = vmatprep.subr.bf16.mxu1 %v1930_v41  ;;  %v295_v41 = vld [vmem:[#allocation5 + $0x490] sm:$0xff]  ;;  %v316_v59 = vld [vmem:[#allocation5 + $0x538] sm:$0xff]  ;;  %v1732_v60 = vpack.c.bf16 %v305_v52, %v301_v51  ;;  %v318_v4 = vld [vmem:[#allocation5 + $0x548] sm:$0xff] }
  0xb7   :  { %v311_v1 = vld [vmem:[#allocation5 + $0x510] sm:$0xff]  ;;  %v1958_v2 = vpack.c.bf16 %v316_v59, %v312_v58  ;;  %v322_v5 = vld [vmem:[#allocation5 + $0x568] sm:$0xff]  ;;  %v320_v6 = vld [vmem:[#allocation5 + $0x558] sm:$0xff] }
  0xb8   :  { %1709 = vmatpush1.bf16.msra.mxu0 %v1708_v47  ;;  %v308_v47 = vld [vmem:[#allocation5 + $0x4f8] sm:$0xff]  ;;  %v1738_v10 = vpack.c.bf16 %v322_v5, %v318_v4  ;;  %v323_v15 = vld [vmem:[#allocation5 + $0x570] sm:$0xff]  ;;  %v326_v16 = vld [vmem:[#allocation5 + $0x588] sm:$0xff] }
  0xb9   :  { %1933 = vmatpush1.bf16.msra.mxu1 %v1932_v49  ;;  %1711 = vmatprep.subr.bf16.mxu0 %v1710_v50  ;;  %v1952_v49 = vpack.c.bf16 %v299_v43, %v295_v41  ;;  %v1730_v50 = vpack.c.bf16 %v306_v45, %v302_v44  ;;  %v324_v7 = vld [vmem:[#allocation5 + $0x578] sm:$0xff]  ;;  %v334_v28 = vld [vmem:[#allocation5 + $0x5c8] sm:$0xff]  ;;  %v335_v39 = vld [vmem:[#allocation5 + $0x5d0] sm:$0xff] }
  0xba   :  { %1935 = vmatprep.subr.bf16.mxu1 %v1934_v54  ;;  %v1954_v54 = vpack.c.bf16 %v308_v47, %v304_v46  ;;  %v1962_v14 = vpack.c.bf16 %v324_v7, %v320_v6  ;;  %v328_v18 = vld [vmem:[#allocation5 + $0x598] sm:$0xff]  ;;  %v338_v29 = vld [vmem:[#allocation5 + $0x5e8] sm:$0xff]  ;;  %v339_v43 = vld [vmem:[#allocation5 + $0x5f0] sm:$0xff] }
  0xbb   :  { %v332_v19 = vld [vmem:[#allocation5 + $0x5b8] sm:$0xff]  ;;  %v342_v44 = vld [vmem:[#allocation5 + $0x608] sm:$0xff]  ;;  %v341_v52 = vld [vmem:[#allocation5 + $0x600] sm:$0xff] }
  0xbc   :  { %1713 = vmatpush1.bf16.msra.mxu0 %v1712_v61  ;;  %v1956_v61 = vpack.c.bf16 %v307_v55, %v303_v53  ;;  %v1966_v27 = vpack.c.bf16 %v332_v19, %v328_v18  ;;  %v336_v31 = vld [vmem:[#allocation5 + $0x5d8] sm:$0xff]  ;;  %v346_v45 = vld [vmem:[#allocation5 + $0x628] sm:$0xff]  ;;  %v345_v53 = vld [vmem:[#allocation5 + $0x620] sm:$0xff] }
  0xbd   :  { %1937 = vmatpush1.bf16.msra.mxu1 %v1936_v62  ;;  %1715 = vmatprep.subr.bf16.mxu0 %v1714_v63  ;;  %v1734_v62 = vpack.c.bf16 %v314_v57, %v310_v56  ;;  %v309_v63 = vld [vmem:[#allocation5 + $0x500] sm:$0xff]  ;;  %v340_v32 = vld [vmem:[#allocation5 + $0x5f8] sm:$0xff]  ;;  %v1750_v51 = vpack.c.bf16 %v346_v45, %v342_v44  ;;  %v347_v56 = vld [vmem:[#allocation5 + $0x630] sm:$0xff] }
  0xbe   :  { %1939 = vmatprep.subr.bf16.mxu1 %v1938_v3  ;;  %v315_v3 = vld [vmem:[#allocation5 + $0x530] sm:$0xff]  ;;  %v1736_v8 = vpack.c.bf16 %v313_v0, %v309_v63  ;;  %v344_v46 = vld [vmem:[#allocation5 + $0x618] sm:$0xff]  ;;  %v350_v57 = vld [vmem:[#allocation5 + $0x648] sm:$0xff] }
  0xbf   :  { %v1960_v9 = vpack.c.bf16 %v315_v3, %v311_v1  ;;  %v348_v47 = vld [vmem:[#allocation5 + $0x638] sm:$0xff]  ;;  %v354_v58 = vld [vmem:[#allocation5 + $0x668] sm:$0xff]  ;;  %v349_v0 = vld [vmem:[#allocation5 + $0x640] sm:$0xff] }
  0xc0   :  { %1717 = vmatpush1.bf16.msra.mxu0 %v1716_v11  ;;  %v317_v11 = vld [vmem:[#allocation5 + $0x540] sm:$0xff]  ;;  %v1974_v55 = vpack.c.bf16 %v348_v47, %v344_v46  ;;  %v352_v59 = vld [vmem:[#allocation5 + $0x658] sm:$0xff]  ;;  %v1754_v63 = vpack.c.bf16 %v354_v58, %v350_v57  ;;  %v355_v4 = vld [vmem:[#allocation5 + $0x670] sm:$0xff] }
  0xc1   :  { %1941 = vmatpush1.bf16.msra.mxu1 %v1940_v12  ;;  %1719 = vmatprep.subr.bf16.mxu0 %v1718_v13  ;;  %v321_v12 = vld [vmem:[#allocation5 + $0x560] sm:$0xff]  ;;  %v319_v13 = vld [vmem:[#allocation5 + $0x550] sm:$0xff]  ;;  %v358_v5 = vld [vmem:[#allocation5 + $0x688] sm:$0xff] }
  0xc2   :  { %1943 = vmatprep.subr.bf16.mxu1 %v1942_v17  ;;  %v330_v17 = vld [vmem:[#allocation5 + $0x5a8] sm:$0xff]  ;;  %v1740_v20 = vpack.c.bf16 %v321_v12, %v317_v11  ;;  %v1964_v22 = vpack.c.bf16 %v323_v15, %v319_v13  ;;  %v353_v1 = vld [vmem:[#allocation5 + $0x660] sm:$0xff]  ;;  %v360_v7 = vld [vmem:[#allocation5 + $0x698] sm:$0xff] }
  0xc3   :  { %684 = vmatmul.mubr.f32.vlgmr.msra.gmra.mrb[0].mxu0 %v142_v21  ;;  %v1742_v23 = vpack.c.bf16 %v330_v17, %v326_v16  ;;  %v362_v6 = vld [vmem:[#allocation5 + $0x6a8] sm:$0xff]  ;;  %v357_v12 = vld [vmem:[#allocation5 + $0x680] sm:$0xff]  ;;  %v363_v16 = vld [vmem:[#allocation5 + $0x6b0] sm:$0xff] }
  0xc4   :  { %1721 = vmatpush1.bf16.msra.mxu0 %v1720_v24  ;;  %968 = vmatmul.mubr.f32.vlgmr.msra.gmra.mrb[0].mxu1 %v142_v21  ;;  %v325_v21 = vld [vmem:[#allocation5 + $0x580] sm:$0xff]  ;;  %v1758_v11 = vpack.c.bf16 %v362_v6, %v358_v5  ;;  %v366_v17 = vld [vmem:[#allocation5 + $0x6c8] sm:$0xff]  ;;  %v368_v19 = vld [vmem:[#allocation5 + $0x6d8] sm:$0xff] }
  0xc5   :  { %1945 = vmatpush1.bf16.msra.mxu1 %v1944_v25  ;;  %1723 = vmatprep.subr.bf16.mxu0 %v1722_v26  ;;  %v329_v24 = vld [vmem:[#allocation5 + $0x5a0] sm:$0xff]  ;;  %v327_v25 = vld [vmem:[#allocation5 + $0x590] sm:$0xff]  ;;  %v370_v18 = vld [vmem:[#allocation5 + $0x6e8] sm:$0xff] }
  0xc6   :  { %1947 = vmatprep.subr.bf16.mxu1 %v1946_v30  ;;  %v331_v26 = vld [vmem:[#allocation5 + $0x5b0] sm:$0xff]  ;;  %v117_v30 = vld [vmem:[#allocation2 + $0x18] sm:$0xff]  ;;  %v1744_v34 = vpack.c.bf16 %v329_v24, %v325_v21  ;;  %v388_v44 = vld [vmem:[#allocation5 + $0x778] sm:$0xff] }
  0xc7   :  { %v124_v33 = vmul.f32 %v117_v30, %v117_v30  ;;  %v1968_v35 = vpack.c.bf16 %v331_v26, %v327_v25  ;;  %v361_v13 = vld [vmem:[#allocation5 + $0x6a0] sm:$0xff]  ;;  %v367_v26 = vld [vmem:[#allocation5 + $0x6d0] sm:$0xff]  ;;  %v116_v58 = vld [vmem:[#allocation2 + $0x10] sm:$0xff] }
  0xc8   :  { %1725 = vmatpush1.bf16.msra.mxu0 %v1724_v36  ;;  %v1746_v36 = vpack.c.bf16 %v338_v29, %v334_v28  ;;  %v1760_v21 = vpack.c.bf16 %v361_v13, %v357_v12  ;;  %v365_v24 = vld [vmem:[#allocation5 + $0x6c0] sm:$0xff]  ;;  %v371_v28 = vld [vmem:[#allocation5 + $0x6f0] sm:$0xff]  ;;  %v374_v29 = vld [vmem:[#allocation5 + $0x708] sm:$0xff]  ;;  %v123_v6 = vmul.f32 %v116_v58, %v116_v58 }
  0xc9   :  { %1949 = vmatpush1.bf16.msra.mxu1 %v1948_v37  ;;  %1727 = vmatprep.subr.bf16.mxu0 %v1726_v38  ;;  %v333_v37 = vld [vmem:[#allocation5 + $0x5c0] sm:$0xff]  ;;  %v131_v40 = vadd.f32 %v124_v33, %v117_v30  ;;  %v138_v41 = vmul.f32 %v124_v33, %v117_v30  ;;  %v378_v30 = vld [vmem:[#allocation5 + $0x728] sm:$0xff]  ;;  %v404_v5 = vld [vmem:[#allocation5 + $0x7f8] sm:$0xff] }
  0xca   :  { %1951 = vmatprep.subr.bf16.mxu1 %v1950_v42  ;;  %v337_v38 = vld [vmem:[#allocation5 + $0x5e0] sm:$0xff]  ;;  %v1970_v42 = vpack.c.bf16 %v340_v32, %v336_v31  ;;  %v376_v31 = vld [vmem:[#allocation5 + $0x718] sm:$0xff]  ;;  %v399_v12 = vld [vmem:[#allocation5 + $0x7d0] sm:$0xff] }
  0xcb   :  { %v369_v25 = vld [vmem:[#allocation5 + $0x6e0] sm:$0xff]  ;;  %v380_v32 = vld [vmem:[#allocation5 + $0x738] sm:$0xff] }
  0xcc   :  { %1729 = vmatpush1.bf16.msra.mxu0 %v1728_v48  ;;  %v145_v48 = vadd.f32 %v138_v41, %v131_v40  ;;  %v1764_v33 = vpack.c.bf16 %v369_v25, %v365_v24  ;;  %v379_v40 = vld [vmem:[#allocation5 + $0x730] sm:$0xff]  ;;  %v382_v41 = vld [vmem:[#allocation5 + $0x748] sm:$0xff]  ;;  %v405_v24 = vld [vmem:[#allocation5 + $0x800] sm:$0xff] }
  0xcd   :  { %1953 = vmatpush1.bf16.msra.mxu1 %v1952_v49  ;;  %1731 = vmatprep.subr.bf16.mxu0 %v1730_v50  ;;  %v1748_v49 = vpack.c.bf16 %v337_v38, %v333_v37  ;;  %v1972_v50 = vpack.c.bf16 %v339_v43, %v335_v39  ;;  %v377_v37 = vld [vmem:[#allocation5 + $0x720] sm:$0xff]  ;;  %v375_v38 = vld [vmem:[#allocation5 + $0x710] sm:$0xff]  ;;  %v1990_v39 = vpack.c.bf16 %v380_v32, %v376_v31  ;;  %v384_v43 = vld [vmem:[#allocation5 + $0x758] sm:$0xff] }
  0xce   :  { %1955 = vmatprep.subr.bf16.mxu1 %v1954_v54  ;;  %v343_v54 = vld [vmem:[#allocation5 + $0x610] sm:$0xff]  ;;  %754 = vmatprep.mubr.f32.mxu0 %v145_v48  ;;  %v1992_v46 = vpack.c.bf16 %v379_v40, %v375_v38  ;;  %v409_v25 = vld [vmem:[#allocation5 + $0x820] sm:$0xff]  ;;  %v416_v32 = vld [vmem:[#allocation5 + $0x858] sm:$0xff] }
  0xcf   :  { %1038 = vmatprep.mubr.f32.mxu1 %v145_v48  ;;  %v381_v48 = vld [vmem:[#allocation5 + $0x740] sm:$0xff]  ;;  %v119_v40 = vld [vmem:[#allocation2 + $0x28] sm:$0xff] }
  0xd0   :  { %1733 = vmatpush1.bf16.msra.mxu0 %v1732_v60  ;;  %v356_v60 = vld [vmem:[#allocation5 + $0x678] sm:$0xff]  ;;  %v417_v38 = vld [vmem:[#allocation5 + $0x860] sm:$0xff] }
  0xd1   :  { %1957 = vmatpush1.bf16.msra.mxu1 %v1956_v61  ;;  %1735 = vmatprep.subr.bf16.mxu0 %v1734_v62  ;;  %v1752_v61 = vpack.c.bf16 %v345_v53, %v341_v52  ;;  %v1976_v62 = vpack.c.bf16 %v347_v56, %v343_v54  ;;  %v1978_v3 = vpack.c.bf16 %v356_v60, %v352_v59  ;;  %v387_v52 = vld [vmem:[#allocation5 + $0x770] sm:$0xff]  ;;  %v390_v53 = vld [vmem:[#allocation5 + $0x788] sm:$0xff]  ;;  %v396_v56 = vld [vmem:[#allocation5 + $0x7b8] sm:$0xff] }
  0xd2   :  { %1959 = vmatprep.subr.bf16.mxu1 %v1958_v2  ;;  %v351_v2 = vld [vmem:[#allocation5 + $0x650] sm:$0xff]  ;;  %v394_v54 = vld [vmem:[#allocation5 + $0x7a8] sm:$0xff] }
  0xd3   :  { %v1774_v60 = vpack.c.bf16 %v394_v54, %v390_v53  ;;  %v421_v53 = vld [vmem:[#allocation5 + $0x880] sm:$0xff] }
  0xd4   :  { %1737 = vmatpush1.bf16.msra.mxu0 %v1736_v8  ;;  %v364_v8 = vld [vmem:[#allocation5 + $0x6b8] sm:$0xff]  ;;  %v425_v54 = vld [vmem:[#allocation5 + $0x8a0] sm:$0xff] }
  0xd5   :  { %1961 = vmatpush1.bf16.msra.mxu1 %v1960_v9  ;;  %1739 = vmatprep.subr.bf16.mxu0 %v1738_v10  ;;  %v1756_v9 = vpack.c.bf16 %v353_v1, %v349_v0  ;;  %v1980_v10 = vpack.c.bf16 %v355_v4, %v351_v2  ;;  %v1982_v15 = vpack.c.bf16 %v364_v8, %v360_v7  ;;  %v395_v1 = vld [vmem:[#allocation5 + $0x7b0] sm:$0xff]  ;;  %v398_v2 = vld [vmem:[#allocation5 + $0x7c8] sm:$0xff]  ;;  %v400_v4 = vld [vmem:[#allocation5 + $0x7d8] sm:$0xff] }
  0xd6   :  { %1963 = vmatprep.subr.bf16.mxu1 %v1962_v14  ;;  %v359_v14 = vld [vmem:[#allocation5 + $0x690] sm:$0xff]  ;;  %v2002_v13 = vpack.c.bf16 %v404_v5, %v400_v4 }
  0xd7   :  { %v431_v4 = vld [vmem:[#allocation5 + $0x8d0] sm:$0xff] }
  0xd8   :  { %1741 = vmatpush1.bf16.msra.mxu0 %v1740_v20  ;;  %v372_v20 = vld [vmem:[#allocation5 + $0x6f8] sm:$0xff] }
  0xd9   :  { %1965 = vmatpush1.bf16.msra.mxu1 %v1964_v22  ;;  %1743 = vmatprep.subr.bf16.mxu0 %v1742_v23  ;;  %v1984_v22 = vpack.c.bf16 %v363_v16, %v359_v14  ;;  %v1762_v23 = vpack.c.bf16 %v370_v18, %v366_v17  ;;  %v403_v14 = vld [vmem:[#allocation5 + $0x7f0] sm:$0xff]  ;;  %v410_v16 = vld [vmem:[#allocation5 + $0x828] sm:$0xff]  ;;  %v408_v17 = vld [vmem:[#allocation5 + $0x818] sm:$0xff] }
  0xda   :  { %1967 = vmatprep.subr.bf16.mxu1 %v1966_v27  ;;  %v1986_v27 = vpack.c.bf16 %v372_v20, %v368_v19  ;;  %v412_v18 = vld [vmem:[#allocation5 + $0x838] sm:$0xff]  ;;  %v130_v19 = vadd.f32 %v123_v6, %v116_v58  ;;  %v137_v20 = vmul.f32 %v123_v6, %v116_v58  ;;  %v430_v58 = vld [vmem:[#allocation5 + $0x8c8] sm:$0xff]  ;;  %v435_v6 = vld [vmem:[#allocation5 + $0x8f0] sm:$0xff] }
  0xdc   :  { %1745 = vmatpush1.bf16.msra.mxu0 %v1744_v34  ;;  %v1988_v34 = vpack.c.bf16 %v371_v28, %v367_v26  ;;  %v407_v26 = vld [vmem:[#allocation5 + $0x810] sm:$0xff]  ;;  %v144_v31 = vadd.f32 %v137_v20, %v130_v19  ;;  %v446_v19 = vld [vmem:[#allocation5 + $0x948] sm:$0xff] }
  0xdd   :  { %1969 = vmatpush1.bf16.msra.mxu1 %v1968_v35  ;;  %1747 = vmatprep.subr.bf16.mxu0 %v1746_v36  ;;  %v1766_v35 = vpack.c.bf16 %v378_v30, %v374_v29  ;;  %v373_v36 = vld [vmem:[#allocation5 + $0x700] sm:$0xff]  ;;  %v411_v28 = vld [vmem:[#allocation5 + $0x830] sm:$0xff]  ;;  %v414_v29 = vld [vmem:[#allocation5 + $0x848] sm:$0xff] }
  0xde   :  { %1971 = vmatprep.subr.bf16.mxu1 %v1970_v42  ;;  %v386_v42 = vld [vmem:[#allocation5 + $0x768] sm:$0xff]  ;;  %v1768_v45 = vpack.c.bf16 %v377_v37, %v373_v36  ;;  %v2008_v36 = vpack.c.bf16 %v411_v28, %v407_v26  ;;  %v445_v26 = vld [vmem:[#allocation5 + $0x940] sm:$0xff]  ;;  %v447_v28 = vld [vmem:[#allocation5 + $0x950] sm:$0xff] }
  0xdf   :  { %v1770_v47 = vpack.c.bf16 %v386_v42, %v382_v41  ;;  %v418_v30 = vld [vmem:[#allocation5 + $0x868] sm:$0xff]  ;;  %v419_v42 = vld [vmem:[#allocation5 + $0x870] sm:$0xff] }
  0xe0   :  { %1749 = vmatpush1.bf16.msra.mxu0 %v1748_v49  ;;  %v385_v49 = vld [vmem:[#allocation5 + $0x760] sm:$0xff]  ;;  %v1786_v37 = vpack.c.bf16 %v418_v30, %v414_v29  ;;  %v450_v20 = vld [vmem:[#allocation5 + $0x968] sm:$0xff]  ;;  %v451_v30 = vld [vmem:[#allocation5 + $0x970] sm:$0xff] }
  0xe1   :  { %1973 = vmatpush1.bf16.msra.mxu1 %v1972_v50  ;;  %1751 = vmatprep.subr.bf16.mxu0 %v1750_v51  ;;  %v383_v50 = vld [vmem:[#allocation5 + $0x750] sm:$0xff]  ;;  %v1994_v51 = vpack.c.bf16 %v388_v44, %v384_v43  ;;  %v1772_v57 = vpack.c.bf16 %v385_v49, %v381_v48  ;;  %v422_v43 = vld [vmem:[#allocation5 + $0x888] sm:$0xff] }
  0xe2   :  { %1975 = vmatprep.subr.bf16.mxu1 %v1974_v55  ;;  %v392_v55 = vld [vmem:[#allocation5 + $0x798] sm:$0xff]  ;;  %v1996_v59 = vpack.c.bf16 %v387_v52, %v383_v50  ;;  %v426_v44 = vld [vmem:[#allocation5 + $0x8a8] sm:$0xff] }
  0xe3   :  { %v1998_v0 = vpack.c.bf16 %v396_v56, %v392_v55  ;;  %v1790_v52 = vpack.c.bf16 %v426_v44, %v422_v43  ;;  %v423_v55 = vld [vmem:[#allocation5 + $0x890] sm:$0xff]  ;;  %v462_v43 = vld [vmem:[#allocation5 + $0x9c8] sm:$0xff] }
  0xe4   :  { %1753 = vmatpush1.bf16.msra.mxu0 %v1752_v61  ;;  %v389_v61 = vld [vmem:[#allocation5 + $0x780] sm:$0xff]  ;;  %v466_v44 = vld [vmem:[#allocation5 + $0x9e8] sm:$0xff] }
  0xe5   :  { %1977 = vmatpush1.bf16.msra.mxu1 %v1976_v62  ;;  %1755 = vmatprep.subr.bf16.mxu0 %v1754_v63  ;;  %v393_v62 = vld [vmem:[#allocation5 + $0x7a0] sm:$0xff]  ;;  %v391_v63 = vld [vmem:[#allocation5 + $0x790] sm:$0xff] }
  0xe6   :  { %1979 = vmatprep.subr.bf16.mxu1 %v1978_v3  ;;  %v402_v3 = vld [vmem:[#allocation5 + $0x7e8] sm:$0xff]  ;;  %v1776_v7 = vpack.c.bf16 %v393_v62, %v389_v61  ;;  %v2000_v8 = vpack.c.bf16 %v395_v1, %v391_v63  ;;  %v432_v61 = vld [vmem:[#allocation5 + $0x8d8] sm:$0xff]  ;;  %v1792_v63 = vpack.c.bf16 %v425_v54, %v421_v53  ;;  %v467_v54 = vld [vmem:[#allocation5 + $0x9f0] sm:$0xff] }
  0xe7   :  { %v436_v62 = vld [vmem:[#allocation5 + $0x8f8] sm:$0xff] }
  0xe8   :  { %1757 = vmatpush1.bf16.msra.mxu0 %v1756_v9  ;;  %v1778_v9 = vpack.c.bf16 %v402_v3, %v398_v2  ;;  %v429_v2 = vld [vmem:[#allocation5 + $0x8c0] sm:$0xff]  ;;  %v2018_v5 = vpack.c.bf16 %v436_v62, %v432_v61 }
  0xe9   :  { %1981 = vmatpush1.bf16.msra.mxu1 %v1980_v10  ;;  %1759 = vmatprep.subr.bf16.mxu0 %v1758_v11  ;;  %v397_v10 = vld [vmem:[#allocation5 + $0x7c0] sm:$0xff] }
  0xea   :  { %1983 = vmatprep.subr.bf16.mxu1 %v1982_v15  ;;  %v401_v11 = vld [vmem:[#allocation5 + $0x7e0] sm:$0xff]  ;;  %v406_v15 = vld [vmem:[#allocation5 + $0x808] sm:$0xff] }
  0xeb   :  { %v433_v3 = vld [vmem:[#allocation5 + $0x8e0] sm:$0xff] }
  0xec   :  { %1761 = vmatpush1.bf16.msra.mxu0 %v1760_v21  ;;  %v1780_v21 = vpack.c.bf16 %v401_v11, %v397_v10  ;;  %v444_v10 = vld [vmem:[#allocation5 + $0x938] sm:$0xff]  ;;  %v1796_v11 = vpack.c.bf16 %v433_v3, %v429_v2  ;;  %v469_v62 = vld [vmem:[#allocation5 + $0xa00] sm:$0xff]  ;;  %v475_v2 = vld [vmem:[#allocation5 + $0xa30] sm:$0xff] }
  0xed   :  { %1985 = vmatpush1.bf16.msra.mxu1 %v1984_v22  ;;  %1763 = vmatprep.subr.bf16.mxu0 %v1762_v23  ;;  %v2004_v22 = vpack.c.bf16 %v403_v14, %v399_v12  ;;  %v1782_v23 = vpack.c.bf16 %v410_v16, %v406_v15  ;;  %v2020_v12 = vpack.c.bf16 %v435_v6, %v431_v4  ;;  %v437_v14 = vld [vmem:[#allocation5 + $0x900] sm:$0xff]  ;;  %v439_v16 = vld [vmem:[#allocation5 + $0x910] sm:$0xff]  ;;  %v478_v3 = vld [vmem:[#allocation5 + $0xa48] sm:$0xff] }
  0xee   :  { %1987 = vmatprep.subr.bf16.mxu1 %v1986_v27  ;;  %v2006_v27 = vpack.c.bf16 %v412_v18, %v408_v17  ;;  %v441_v15 = vld [vmem:[#allocation5 + $0x920] sm:$0xff]  ;;  %v443_v18 = vld [vmem:[#allocation5 + $0x930] sm:$0xff]  ;;  %v482_v4 = vld [vmem:[#allocation5 + $0xa68] sm:$0xff] }
  0xef   :  { %v484_v6 = vld [vmem:[#allocation5 + $0xa78] sm:$0xff] }
  0xf0   :  { %1765 = vmatpush1.bf16.msra.mxu0 %v1764_v33  ;;  %v420_v33 = vld [vmem:[#allocation5 + $0x878] sm:$0xff] }
  0xf1   :  { %1989 = vmatpush1.bf16.msra.mxu1 %v1988_v34  ;;  %1767 = vmatprep.subr.bf16.mxu0 %v1766_v35  ;;  %v1784_v34 = vpack.c.bf16 %v409_v25, %v405_v24  ;;  %v413_v35 = vld [vmem:[#allocation5 + $0x840] sm:$0xff]  ;;  %v2010_v41 = vpack.c.bf16 %v420_v33, %v416_v32  ;;  %v2024_v24 = vpack.c.bf16 %v443_v18, %v439_v16  ;;  %v458_v32 = vld [vmem:[#allocation5 + $0x9a8] sm:$0xff]  ;;  %v456_v33 = vld [vmem:[#allocation5 + $0x998] sm:$0xff] }
  0xf2   :  { %1991 = vmatprep.subr.bf16.mxu1 %v1990_v39  ;;  %v415_v39 = vld [vmem:[#allocation5 + $0x850] sm:$0xff]  ;;  %v1788_v48 = vpack.c.bf16 %v417_v38, %v413_v35  ;;  %v1802_v25 = vpack.c.bf16 %v450_v20, %v446_v19  ;;  %v453_v38 = vld [vmem:[#allocation5 + $0x980] sm:$0xff]  ;;  %v490_v16 = vld [vmem:[#allocation5 + $0xaa8] sm:$0xff] }
  0xf3   :  { %v492_v18 = vld [vmem:[#allocation5 + $0xab8] sm:$0xff] }
  0xf4   :  { %1769 = vmatpush1.bf16.msra.mxu0 %v1768_v45  ;;  %v126_v45 = vmul.f32 %v119_v40, %v119_v40 }
  0xf5   :  { %1993 = vmatpush1.bf16.msra.mxu1 %v1992_v46  ;;  %1771 = vmatprep.subr.bf16.mxu0 %v1770_v47  ;;  %v424_v46 = vld [vmem:[#allocation5 + $0x898] sm:$0xff] }
  0xf6   :  { %1995 = vmatprep.subr.bf16.mxu1 %v1994_v51  ;;  %v428_v47 = vld [vmem:[#allocation5 + $0x8b8] sm:$0xff]  ;;  %v133_v49 = vadd.f32 %v126_v45, %v119_v40  ;;  %v140_v50 = vmul.f32 %v126_v45, %v119_v40  ;;  %v2012_v51 = vpack.c.bf16 %v419_v42, %v415_v39  ;;  %v457_v39 = vld [vmem:[#allocation5 + $0x9a0] sm:$0xff]  ;;  %v455_v40 = vld [vmem:[#allocation5 + $0x990] sm:$0xff] }
  0xf7   :  { %v2014_v56 = vpack.c.bf16 %v428_v47, %v424_v46  ;;  %v459_v42 = vld [vmem:[#allocation5 + $0x9b0] sm:$0xff]  ;;  %v464_v45 = vld [vmem:[#allocation5 + $0x9d8] sm:$0xff]  ;;  %v1808_v47 = vpack.c.bf16 %v457_v39, %v453_v38  ;;  %v502_v39 = vld [vmem:[#allocation5 + $0xb08] sm:$0xff] }
  0xf8   :  { %1773 = vmatpush1.bf16.msra.mxu0 %v1772_v57  ;;  %v427_v57 = vld [vmem:[#allocation5 + $0x8b0] sm:$0xff]  ;;  %v468_v46 = vld [vmem:[#allocation5 + $0x9f8] sm:$0xff] }
  0xf9   :  { %1997 = vmatpush1.bf16.msra.mxu1 %v1996_v59  ;;  %1775 = vmatprep.subr.bf16.mxu0 %v1774_v60  ;;  %v434_v59 = vld [vmem:[#allocation5 + $0x8e8] sm:$0xff]  ;;  %v147_v60 = vadd.f32 %v140_v50, %v133_v49  ;;  %v1810_v49 = vpack.c.bf16 %v466_v44, %v462_v43  ;;  %v461_v50 = vld [vmem:[#allocation5 + $0x9c0] sm:$0xff]  ;;  %v2034_v53 = vpack.c.bf16 %v468_v46, %v464_v45  ;;  %v499_v38 = vld [vmem:[#allocation5 + $0xaf0] sm:$0xff] }
  0xfa   :  { %1999 = vmatprep.subr.bf16.mxu1 %v1998_v0  ;;  %v2016_v0 = vpack.c.bf16 %v427_v57, %v423_v55  ;;  %v1794_v1 = vpack.c.bf16 %v434_v59, %v430_v58  ;;  %v470_v55 = vld [vmem:[#allocation5 + $0xa08] sm:$0xff]  ;;  %v472_v57 = vld [vmem:[#allocation5 + $0xa18] sm:$0xff]  ;;  %v501_v46 = vld [vmem:[#allocation5 + $0xb00] sm:$0xff] }
  0xfb   :  { %v476_v58 = vld [vmem:[#allocation5 + $0xa38] sm:$0xff] }
  0xfc   :  { %1777 = vmatpush1.bf16.msra.mxu0 %v1776_v7  ;;  %v438_v7 = vld [vmem:[#allocation5 + $0x908] sm:$0xff] }
  0xfd   :  { %2001 = vmatpush1.bf16.msra.mxu1 %v2000_v8  ;;  %1779 = vmatprep.subr.bf16.mxu0 %v1778_v9  ;;  %v442_v8 = vld [vmem:[#allocation5 + $0x928] sm:$0xff]  ;;  %v440_v9 = vld [vmem:[#allocation5 + $0x918] sm:$0xff] }
  0xfe   :  { %2003 = vmatprep.subr.bf16.mxu1 %v2002_v13  ;;  %v1798_v13 = vpack.c.bf16 %v442_v8, %v438_v7  ;;  %v2022_v17 = vpack.c.bf16 %v444_v10, %v440_v9  ;;  %v1818_v9 = vpack.c.bf16 %v482_v4, %v478_v3  ;;  %v477_v10 = vld [vmem:[#allocation5 + $0xa40] sm:$0xff]  ;;  %v118_v4 = vld [vmem:[#allocation2 + $0x20] sm:$0xff] }
 0x100   :  { %1781 = vmatpush1.bf16.msra.mxu0 %v1780_v21  ;;  %v448_v21 = vld [vmem:[#allocation5 + $0x958] sm:$0xff] }
 0x101   :  { %2005 = vmatpush1.bf16.msra.mxu1 %v2004_v22  ;;  %1783 = vmatprep.subr.bf16.mxu0 %v1782_v23  ;;  %v452_v22 = vld [vmem:[#allocation5 + $0x978] sm:$0xff]  ;;  %v1800_v23 = vpack.c.bf16 %v441_v15, %v437_v14  ;;  %v483_v14 = vld [vmem:[#allocation5 + $0xa70] sm:$0xff]  ;;  %v486_v15 = vld [vmem:[#allocation5 + $0xa88] sm:$0xff] }
 0x102   :  { %2007 = vmatprep.subr.bf16.mxu1 %v2006_v27  ;;  %v449_v27 = vld [vmem:[#allocation5 + $0x960] sm:$0xff]  ;;  %v2026_v29 = vpack.c.bf16 %v452_v22, %v448_v21  ;;  %v1822_v21 = vpack.c.bf16 %v490_v16, %v486_v15  ;;  %v532_v15 = vld [vmem:[#allocation5 + $0xbf8] sm:$0xff]  ;;  %v125_v16 = vmul.f32 %v118_v4, %v118_v4 }
 0x103   :  { %755 = vmatmul.mubr.f32.vlgmr.msra.gmra.mrb[0].mxu0 %v144_v31  ;;  %v1804_v35 = vpack.c.bf16 %v449_v27, %v445_v26  ;;  %v485_v22 = vld [vmem:[#allocation5 + $0xa80] sm:$0xff]  ;;  %v491_v26 = vld [vmem:[#allocation5 + $0xab0] sm:$0xff]  ;;  %v494_v27 = vld [vmem:[#allocation5 + $0xac8] sm:$0xff] }
 0x104   :  { %1785 = vmatpush1.bf16.msra.mxu0 %v1784_v34  ;;  %1039 = vmatmul.mubr.f32.vlgmr.msra.gmra.mrb[0].mxu1 %v144_v31  ;;  %v454_v31 = vld [vmem:[#allocation5 + $0x988] sm:$0xff]  ;;  %v460_v34 = vld [vmem:[#allocation5 + $0x9b8] sm:$0xff] }
 0x105   :  { %2009 = vmatpush1.bf16.msra.mxu1 %v2008_v36  ;;  %1787 = vmatprep.subr.bf16.mxu0 %v1786_v37  ;;  %v2028_v36 = vpack.c.bf16 %v451_v30, %v447_v28  ;;  %v1806_v37 = vpack.c.bf16 %v458_v32, %v454_v31  ;;  %v498_v28 = vld [vmem:[#allocation5 + $0xae8] sm:$0xff]  ;;  %v500_v30 = vld [vmem:[#allocation5 + $0xaf8] sm:$0xff] }
 0x106   :  { %2011 = vmatprep.subr.bf16.mxu1 %v2010_v41  ;;  %825 = vmatprep.mubr.f32.mxu0 %v147_v60  ;;  %v2030_v41 = vpack.c.bf16 %v460_v34, %v456_v33  ;;  %v1826_v33 = vpack.c.bf16 %v498_v28, %v494_v27  ;;  %v493_v34 = vld [vmem:[#allocation5 + $0xac0] sm:$0xff]  ;;  %v536_v27 = vld [vmem:[#allocation5 + $0xc18] sm:$0xff] }
 0x107   :  { %1109 = vmatprep.mubr.f32.mxu1 %v147_v60  ;;  %v540_v28 = vld [vmem:[#allocation5 + $0xc38] sm:$0xff] }
 0x108   :  { %1789 = vmatpush1.bf16.msra.mxu0 %v1788_v48  ;;  %v2032_v48 = vpack.c.bf16 %v459_v42, %v455_v40  ;;  %v506_v40 = vld [vmem:[#allocation5 + $0xb28] sm:$0xff]  ;;  %v508_v42 = vld [vmem:[#allocation5 + $0xb38] sm:$0xff] }
 0x109   :  { %2013 = vmatpush1.bf16.msra.mxu1 %v2012_v51  ;;  %1791 = vmatprep.subr.bf16.mxu0 %v1790_v52  ;;  %v465_v51 = vld [vmem:[#allocation5 + $0x9e0] sm:$0xff]  ;;  %v463_v52 = vld [vmem:[#allocation5 + $0x9d0] sm:$0xff]  ;;  %v1830_v45 = vpack.c.bf16 %v506_v40, %v502_v39  ;;  %v542_v39 = vld [vmem:[#allocation5 + $0xc48] sm:$0xff] }
 0x10a   :  { %2015 = vmatprep.subr.bf16.mxu1 %v2014_v56  ;;  %v474_v56 = vld [vmem:[#allocation5 + $0xa28] sm:$0xff]  ;;  %v1812_v59 = vpack.c.bf16 %v465_v51, %v461_v50  ;;  %v2036_v60 = vpack.c.bf16 %v467_v54, %v463_v52  ;;  %v507_v50 = vld [vmem:[#allocation5 + $0xb30] sm:$0xff]  ;;  %v516_v54 = vld [vmem:[#allocation5 + $0xb78] sm:$0xff] }
 0x10b   :  { %v1814_v61 = vpack.c.bf16 %v474_v56, %v470_v55  ;;  %v510_v51 = vld [vmem:[#allocation5 + $0xb48] sm:$0xff] }
 0x10c   :  { %1793 = vmatpush1.bf16.msra.mxu0 %v1792_v63  ;;  %v473_v63 = vld [vmem:[#allocation5 + $0xa20] sm:$0xff]  ;;  %v514_v52 = vld [vmem:[#allocation5 + $0xb68] sm:$0xff] }
 0x10d   :  { %2017 = vmatpush1.bf16.msra.mxu1 %v2016_v0  ;;  %1795 = vmatprep.subr.bf16.mxu0 %v1794_v1  ;;  %v471_v0 = vld [vmem:[#allocation5 + $0xa10] sm:$0xff]  ;;  %v2038_v1 = vpack.c.bf16 %v476_v58, %v472_v57  ;;  %v1816_v7 = vpack.c.bf16 %v473_v63, %v469_v62  ;;  %v1834_v57 = vpack.c.bf16 %v514_v52, %v510_v51  ;;  %v509_v58 = vld [vmem:[#allocation5 + $0xb40] sm:$0xff]  ;;  %v518_v63 = vld [vmem:[#allocation5 + $0xb88] sm:$0xff] }
 0x10e   :  { %2019 = vmatprep.subr.bf16.mxu1 %v2018_v5  ;;  %v480_v5 = vld [vmem:[#allocation5 + $0xa58] sm:$0xff]  ;;  %v2040_v8 = vpack.c.bf16 %v475_v2, %v471_v0  ;;  %v515_v62 = vld [vmem:[#allocation5 + $0xb70] sm:$0xff]  ;;  %v522_v0 = vld [vmem:[#allocation5 + $0xba8] sm:$0xff] }
 0x10f   :  { %v524_v2 = vld [vmem:[#allocation5 + $0xbb8] sm:$0xff]  ;;  %v546_v40 = vld [vmem:[#allocation5 + $0xc68] sm:$0xff]  ;;  %v547_v51 = vld [vmem:[#allocation5 + $0xc70] sm:$0xff] }
 0x110   :  { %1797 = vmatpush1.bf16.msra.mxu0 %v1796_v11  ;;  %v481_v11 = vld [vmem:[#allocation5 + $0xa60] sm:$0xff]  ;;  %v550_v52 = vld [vmem:[#allocation5 + $0xc88] sm:$0xff] }
 0x111   :  { %2021 = vmatpush1.bf16.msra.mxu1 %v2020_v12  ;;  %1799 = vmatprep.subr.bf16.mxu0 %v1798_v13  ;;  %v479_v12 = vld [vmem:[#allocation5 + $0xa50] sm:$0xff]  ;;  %v2042_v13 = vpack.c.bf16 %v484_v6, %v480_v5  ;;  %v1820_v19 = vpack.c.bf16 %v481_v11, %v477_v10  ;;  %v1838_v6 = vpack.c.bf16 %v522_v0, %v518_v63  ;;  %v558_v0 = vld [vmem:[#allocation5 + $0xcc8] sm:$0xff] }
 0x112   :  { %2023 = vmatprep.subr.bf16.mxu1 %v2022_v17  ;;  %v488_v17 = vld [vmem:[#allocation5 + $0xa98] sm:$0xff]  ;;  %v2044_v20 = vpack.c.bf16 %v483_v14, %v479_v12  ;;  %v523_v11 = vld [vmem:[#allocation5 + $0xbb0] sm:$0xff]  ;;  %v526_v12 = vld [vmem:[#allocation5 + $0xbc8] sm:$0xff] }
 0x113   :  { %v528_v14 = vld [vmem:[#allocation5 + $0xbd8] sm:$0xff]  ;;  %v555_v63 = vld [vmem:[#allocation5 + $0xcb0] sm:$0xff] }
 0x114   :  { %1801 = vmatpush1.bf16.msra.mxu0 %v1800_v23  ;;  %v489_v23 = vld [vmem:[#allocation5 + $0xaa0] sm:$0xff] }
 0x115   :  { %2025 = vmatpush1.bf16.msra.mxu1 %v2024_v24  ;;  %1803 = vmatprep.subr.bf16.mxu0 %v1802_v25  ;;  %v487_v24 = vld [vmem:[#allocation5 + $0xa90] sm:$0xff]  ;;  %v2046_v25 = vpack.c.bf16 %v492_v18, %v488_v17  ;;  %v1824_v31 = vpack.c.bf16 %v489_v23, %v485_v22  ;;  %v2066_v23 = vpack.c.bf16 %v532_v15, %v528_v14  ;;  %v570_v14 = vld [vmem:[#allocation5 + $0xd28] sm:$0xff]  ;;  %v568_v15 = vld [vmem:[#allocation5 + $0xd18] sm:$0xff] }
 0x116   :  { %2027 = vmatprep.subr.bf16.mxu1 %v2026_v29  ;;  %v496_v29 = vld [vmem:[#allocation5 + $0xad8] sm:$0xff]  ;;  %v2048_v32 = vpack.c.bf16 %v491_v26, %v487_v24  ;;  %v527_v22 = vld [vmem:[#allocation5 + $0xbd0] sm:$0xff]  ;;  %v538_v26 = vld [vmem:[#allocation5 + $0xc28] sm:$0xff] }
 0x117   :  { %v531_v24 = vld [vmem:[#allocation5 + $0xbf0] sm:$0xff] }
 0x118   :  { %1805 = vmatpush1.bf16.msra.mxu0 %v1804_v35  ;;  %v497_v35 = vld [vmem:[#allocation5 + $0xae0] sm:$0xff] }
 0x119   :  { %2029 = vmatpush1.bf16.msra.mxu1 %v2028_v36  ;;  %1807 = vmatprep.subr.bf16.mxu0 %v1806_v37  ;;  %v495_v36 = vld [vmem:[#allocation5 + $0xad0] sm:$0xff]  ;;  %v2050_v37 = vpack.c.bf16 %v500_v30, %v496_v29  ;;  %v1828_v43 = vpack.c.bf16 %v497_v35, %v493_v34  ;;  %v132_v29 = vadd.f32 %v125_v16, %v118_v4  ;;  %v533_v34 = vld [vmem:[#allocation5 + $0xc00] sm:$0xff] }
 0x11a   :  { %2031 = vmatprep.subr.bf16.mxu1 %v2030_v41  ;;  %v504_v41 = vld [vmem:[#allocation5 + $0xb18] sm:$0xff]  ;;  %v2052_v44 = vpack.c.bf16 %v499_v38, %v495_v36  ;;  %v139_v30 = vmul.f32 %v125_v16, %v118_v4  ;;  %v537_v35 = vld [vmem:[#allocation5 + $0xc20] sm:$0xff]  ;;  %v535_v36 = vld [vmem:[#allocation5 + $0xc10] sm:$0xff] }
 0x11b   :  { %v539_v38 = vld [vmem:[#allocation5 + $0xc30] sm:$0xff]  ;;  %v564_v4 = vld [vmem:[#allocation5 + $0xcf8] sm:$0xff] }
 0x11c   :  { %1809 = vmatpush1.bf16.msra.mxu0 %v1808_v47  ;;  %v505_v47 = vld [vmem:[#allocation5 + $0xb20] sm:$0xff]  ;;  %v572_v16 = vld [vmem:[#allocation5 + $0xd38] sm:$0xff] }
 0x11d   :  { %2033 = vmatpush1.bf16.msra.mxu1 %v2032_v48  ;;  %1811 = vmatprep.subr.bf16.mxu0 %v1810_v49  ;;  %v503_v48 = vld [vmem:[#allocation5 + $0xb10] sm:$0xff]  ;;  %v2054_v49 = vpack.c.bf16 %v508_v42, %v504_v41  ;;  %v1832_v55 = vpack.c.bf16 %v505_v47, %v501_v46  ;;  %v146_v41 = vadd.f32 %v139_v30, %v132_v29  ;;  %v544_v42 = vld [vmem:[#allocation5 + $0xc58] sm:$0xff]  ;;  %v541_v47 = vld [vmem:[#allocation5 + $0xc40] sm:$0xff] }
 0x11e   :  { %2035 = vmatprep.subr.bf16.mxu1 %v2034_v53  ;;  %v512_v53 = vld [vmem:[#allocation5 + $0xb58] sm:$0xff]  ;;  %v2056_v56 = vpack.c.bf16 %v507_v50, %v503_v48  ;;  %v1850_v46 = vpack.c.bf16 %v546_v40, %v542_v39  ;;  %v545_v48 = vld [vmem:[#allocation5 + $0xc60] sm:$0xff] }
 0x11f   :  { %v584_v39 = vld [vmem:[#allocation5 + $0xd98] sm:$0xff] }
 0x120   :  { %1813 = vmatpush1.bf16.msra.mxu0 %v1812_v59  ;;  %v513_v59 = vld [vmem:[#allocation5 + $0xb60] sm:$0xff]  ;;  %v588_v40 = vld [vmem:[#allocation5 + $0xdb8] sm:$0xff] }
 0x121   :  { %2037 = vmatpush1.bf16.msra.mxu1 %v2036_v60  ;;  %1815 = vmatprep.subr.bf16.mxu0 %v1814_v61  ;;  %v511_v60 = vld [vmem:[#allocation5 + $0xb50] sm:$0xff]  ;;  %v2058_v61 = vpack.c.bf16 %v516_v54, %v512_v53  ;;  %v1836_v3 = vpack.c.bf16 %v513_v59, %v509_v58  ;;  %v554_v53 = vld [vmem:[#allocation5 + $0xca8] sm:$0xff]  ;;  %v552_v54 = vld [vmem:[#allocation5 + $0xc98] sm:$0xff] }
 0x122   :  { %2039 = vmatprep.subr.bf16.mxu1 %v2038_v1  ;;  %v520_v1 = vld [vmem:[#allocation5 + $0xb98] sm:$0xff]  ;;  %v2060_v5 = vpack.c.bf16 %v515_v62, %v511_v60  ;;  %v1854_v58 = vpack.c.bf16 %v554_v53, %v550_v52  ;;  %v549_v59 = vld [vmem:[#allocation5 + $0xc80] sm:$0xff] }
 0x123   :  { %v2062_v10 = vpack.c.bf16 %v524_v2, %v520_v1  ;;  %v553_v60 = vld [vmem:[#allocation5 + $0xca0] sm:$0xff]  ;;  %v562_v1 = vld [vmem:[#allocation5 + $0xce8] sm:$0xff]  ;;  %v2418_v2 = vmov 0.0   ;;  %v592_v52 = vld [vmem:[#allocation5 + $0xdd8] sm:$0xff] }
 0x124   :  { %1817 = vmatpush1.bf16.msra.mxu0 %v1816_v7  ;;  %v517_v7 = vld [vmem:[#allocation5 + $0xb80] sm:$0xff]  ;;  %v596_v53 = vld [vmem:[#allocation5 + $0xdf8] sm:$0xff] }
 0x125   :  { %2041 = vmatpush1.bf16.msra.mxu1 %v2040_v8  ;;  %1819 = vmatprep.subr.bf16.mxu0 %v1818_v9  ;;  %v521_v8 = vld [vmem:[#allocation5 + $0xba0] sm:$0xff]  ;;  %v519_v9 = vld [vmem:[#allocation5 + $0xb90] sm:$0xff] }
 0x126   :  { %2043 = vmatprep.subr.bf16.mxu1 %v2042_v13  ;;  %v530_v13 = vld [vmem:[#allocation5 + $0xbe8] sm:$0xff]  ;;  %v1840_v17 = vpack.c.bf16 %v521_v8, %v517_v7  ;;  %v2064_v18 = vpack.c.bf16 %v523_v11, %v519_v9  ;;  %v1858_v7 = vpack.c.bf16 %v562_v1, %v558_v0  ;;  %v557_v8 = vld [vmem:[#allocation5 + $0xcc0] sm:$0xff] }
 0x127   :  { %v561_v9 = vld [vmem:[#allocation5 + $0xce0] sm:$0xff]  ;;  %v1220_v0 = vld [vmem:[#allocation8 + $0x88] sm:$0xff] }
 0x128   :  { %1821 = vmatpush1.bf16.msra.mxu0 %v1820_v19  ;;  %v1842_v19 = vpack.c.bf16 %v530_v13, %v526_v12  ;;  %v563_v12 = vld [vmem:[#allocation5 + $0xcf0] sm:$0xff]  ;;  %v566_v13 = vld [vmem:[#allocation5 + $0xd08] sm:$0xff] }
 0x129   :  { %2045 = vmatpush1.bf16.msra.mxu1 %v2044_v20  ;;  %1823 = vmatprep.subr.bf16.mxu0 %v1822_v21  ;;  %v525_v20 = vld [vmem:[#allocation5 + $0xbc0] sm:$0xff] }
 0x12a   :  { %2047 = vmatprep.subr.bf16.mxu1 %v2046_v25  ;;  %v529_v21 = vld [vmem:[#allocation5 + $0xbe0] sm:$0xff]  ;;  %v534_v25 = vld [vmem:[#allocation5 + $0xc08] sm:$0xff] }
 0x12c   :  { %1825 = vmatpush1.bf16.msra.mxu0 %v1824_v31  ;;  %v1844_v31 = vpack.c.bf16 %v529_v21, %v525_v20  ;;  %v565_v20 = vld [vmem:[#allocation5 + $0xd00] sm:$0xff] }
 0x12d   :  { %2049 = vmatpush1.bf16.msra.mxu1 %v2048_v32  ;;  %1827 = vmatprep.subr.bf16.mxu0 %v1826_v33  ;;  %v2068_v32 = vpack.c.bf16 %v531_v24, %v527_v22  ;;  %v1846_v33 = vpack.c.bf16 %v538_v26, %v534_v25  ;;  %v569_v21 = vld [vmem:[#allocation5 + $0xd20] sm:$0xff]  ;;  %v567_v22 = vld [vmem:[#allocation5 + $0xd10] sm:$0xff]  ;;  %v574_v25 = vld [vmem:[#allocation5 + $0xd48] sm:$0xff] }
 0x12e   :  { %2051 = vmatprep.subr.bf16.mxu1 %v2050_v37  ;;  %v2070_v37 = vpack.c.bf16 %v540_v28, %v536_v27  ;;  %v571_v24 = vld [vmem:[#allocation5 + $0xd30] sm:$0xff]  ;;  %v578_v26 = vld [vmem:[#allocation5 + $0xd68] sm:$0xff]  ;;  %v576_v27 = vld [vmem:[#allocation5 + $0xd58] sm:$0xff]  ;;  %v1864_v29 = vpack.c.bf16 %v569_v21, %v565_v20 }
 0x12f   :  { %v580_v28 = vld [vmem:[#allocation5 + $0xd78] sm:$0xff]  ;;  %v2088_v30 = vpack.c.bf16 %v571_v24, %v567_v22 }
 0x130   :  { %1829 = vmatpush1.bf16.msra.mxu0 %v1828_v43  ;;  %v548_v43 = vld [vmem:[#allocation5 + $0xc78] sm:$0xff] }
 0x131   :  { %2053 = vmatpush1.bf16.msra.mxu1 %v2052_v44  ;;  %1831 = vmatprep.subr.bf16.mxu0 %v1830_v45  ;;  %v1848_v44 = vpack.c.bf16 %v537_v35, %v533_v34  ;;  %v2072_v45 = vpack.c.bf16 %v539_v38, %v535_v36  ;;  %v2074_v50 = vpack.c.bf16 %v548_v43, %v544_v42  ;;  %v575_v34 = vld [vmem:[#allocation5 + $0xd50] sm:$0xff]  ;;  %v586_v38 = vld [vmem:[#allocation5 + $0xda8] sm:$0xff]  ;;  %v120_v42 = vld [vmem:[#allocation2 + $0x30] sm:$0xff] }
 0x132   :  { %2055 = vmatprep.subr.bf16.mxu1 %v2054_v49  ;;  %v543_v49 = vld [vmem:[#allocation5 + $0xc50] sm:$0xff]  ;;  %v2090_v35 = vpack.c.bf16 %v580_v28, %v576_v27  ;;  %v1223_v27 = vld [vmem:[#allocation8 + $0xa0] sm:$0xff] }
 0x133   :  { %v579_v36 = vld [vmem:[#allocation5 + $0xd70] sm:$0xff] }
 0x134   :  { %1833 = vmatpush1.bf16.msra.mxu0 %v1832_v55  ;;  %v556_v55 = vld [vmem:[#allocation5 + $0xcb8] sm:$0xff]  ;;  %v2092_v43 = vpack.c.bf16 %v579_v36, %v575_v34  ;;  %v1224_v28 = vld [vmem:[#allocation8 + $0xa8] sm:$0xff]  ;;  %v1207_v34 = vld [vmem:[#allocation8 + $0x20] sm:$0xff] }
 0x135   :  { %2057 = vmatpush1.bf16.msra.mxu1 %v2056_v56  ;;  %1835 = vmatprep.subr.bf16.mxu0 %v1834_v57  ;;  %v1852_v56 = vpack.c.bf16 %v545_v48, %v541_v47  ;;  %v2076_v57 = vpack.c.bf16 %v547_v51, %v543_v49  ;;  %v2078_v62 = vpack.c.bf16 %v556_v55, %v552_v54  ;;  %v583_v47 = vld [vmem:[#allocation5 + $0xd90] sm:$0xff]  ;;  %v594_v51 = vld [vmem:[#allocation5 + $0xde8] sm:$0xff] }
 0x136   :  { %2059 = vmatprep.subr.bf16.mxu1 %v2058_v61  ;;  %v551_v61 = vld [vmem:[#allocation5 + $0xc90] sm:$0xff]  ;;  %v2094_v48 = vpack.c.bf16 %v588_v40, %v584_v39  ;;  %v127_v54 = vmul.f32 %v120_v42, %v120_v42  ;;  %v1239_v36 = vld [vmem:[#allocation8 + $0x120] sm:$0xff]  ;;  %v1226_v40 = vld [vmem:[#allocation8 + $0xb8] sm:$0xff] }
 0x137   :  { %v587_v49 = vld [vmem:[#allocation5 + $0xdb0] sm:$0xff] }
 0x138   :  { %1837 = vmatpush1.bf16.msra.mxu0 %v1836_v3  ;;  %v560_v3 = vld [vmem:[#allocation5 + $0xcd8] sm:$0xff]  ;;  %v134_v1 = vadd.f32 %v127_v54, %v120_v42 }
 0x139   :  { %2061 = vmatpush1.bf16.msra.mxu1 %v2060_v5  ;;  %1839 = vmatprep.subr.bf16.mxu0 %v1838_v6  ;;  %v1856_v5 = vpack.c.bf16 %v553_v60, %v549_v59  ;;  %v2080_v6 = vpack.c.bf16 %v555_v63, %v551_v61  ;;  %v2082_v11 = vpack.c.bf16 %v564_v4, %v560_v3  ;;  %v593_v59 = vld [vmem:[#allocation5 + $0xde0] sm:$0xff]  ;;  %v591_v60 = vld [vmem:[#allocation5 + $0xdd0] sm:$0xff] }
 0x13a   :  { %2063 = vmatprep.subr.bf16.mxu1 %v2062_v10  ;;  %v559_v10 = vld [vmem:[#allocation5 + $0xcd0] sm:$0xff]  ;;  %v2098_v61 = vpack.c.bf16 %v596_v53, %v592_v52  ;;  %v1219_v63 = vld [vmem:[#allocation8 + $0x80] sm:$0xff]  ;;  %v141_v3 = vmul.f32 %v127_v54, %v120_v42  ;;  %v1258_v42 = vld [vmem:[#allocation8 + $0x1b8] sm:$0xff] }
 0x13b   :  { %v1251_v4 = vld [vmem:[#allocation8 + $0x180] sm:$0xff]  ;;  %v1205_v22 = vld [vmem:[#allocation8 + $0x10] sm:$0xff]  ;;  %v1228_v52 = vld [vmem:[#allocation8 + $0xc8] sm:$0xff] }
 0x13c   :  { %1841 = vmatpush1.bf16.msra.mxu0 %v1840_v17  ;;  %v1860_v17 = vpack.c.bf16 %v561_v9, %v557_v8  ;;  %v2102_v8 = vpack.c.bf16 %v1220_v0, %v1219_v63  ;;  %v1203_v9 = vld [vmem:[#allocation8] sm:$0xff]  ;;  %v1237_v24 = vld [vmem:[#allocation8 + $0x110] sm:$0xff]  ;;  %v1260_v54 = vld [vmem:[#allocation8 + $0x1c8] sm:$0xff] }
 0x13d   :  { %2065 = vmatpush1.bf16.msra.mxu1 %v2064_v18  ;;  %1843 = vmatprep.subr.bf16.mxu0 %v1842_v19  ;;  %v2084_v18 = vpack.c.bf16 %v563_v12, %v559_v10  ;;  %v1862_v19 = vpack.c.bf16 %v570_v14, %v566_v13  ;;  %v1204_v10 = vld [vmem:[#allocation8 + $0x8] sm:$0xff]  ;;  %v1221_v14 = vld [vmem:[#allocation8 + $0x90] sm:$0xff]  ;;  %v1259_v53 = vld [vmem:[#allocation8 + $0x1c0] sm:$0xff] }
 0x13e   :  { %2067 = vmatprep.subr.bf16.mxu1 %v2066_v23  ;;  %v2086_v23 = vpack.c.bf16 %v572_v16, %v568_v15  ;;  %v1236_v13 = vld [vmem:[#allocation8 + $0x108] sm:$0xff]  ;;  %v1222_v15 = vld [vmem:[#allocation8 + $0x98] sm:$0xff]  ;;  %v148_v16 = vadd.f32 %v141_v3, %v134_v1  ;;  %v1225_v39 = vld [vmem:[#allocation8 + $0xb0] sm:$0xff] }
 0x13f   :  { %v2106_v21 = vpack.c.bf16 %v1222_v15, %v1221_v14  ;;  %v1229_v63 = vld [vmem:[#allocation8 + $0xd0] sm:$0xff]  ;;  %v1230_v0 = vld [vmem:[#allocation8 + $0xd8] sm:$0xff]  ;;  %v1231_v14 = vld [vmem:[#allocation8 + $0xe0] sm:$0xff] }
 0x140   :  { %1845 = vmatpush1.bf16.msra.mxu0 %v1844_v31  ;;  %v1866_v31 = vpack.c.bf16 %v578_v26, %v574_v25  ;;  %v1238_v26 = vld [vmem:[#allocation8 + $0x118] sm:$0xff]  ;;  %v1261_v1 = vld [vmem:[#allocation8 + $0x1d0] sm:$0xff]  ;;  %v1232_v15 = vld [vmem:[#allocation8 + $0xe8] sm:$0xff] }
 0x141   :  { %2069 = vmatpush1.bf16.msra.mxu1 %v2068_v32  ;;  %1847 = vmatprep.subr.bf16.mxu0 %v1846_v33  ;;  %v573_v32 = vld [vmem:[#allocation5 + $0xd40] sm:$0xff] }
 0x142   :  { %2071 = vmatprep.subr.bf16.mxu1 %v2070_v37  ;;  %v577_v33 = vld [vmem:[#allocation5 + $0xd60] sm:$0xff]  ;;  %v582_v37 = vld [vmem:[#allocation5 + $0xd88] sm:$0xff] }
 0x143   :  { %826 = vmatmul.mubr.f32.vlgmr.msra.gmra.mrb[0].mxu0 %v146_v41  ;;  %v1262_v3 = vld [vmem:[#allocation8 + $0x1d8] sm:$0xff] }
 0x144   :  { %1849 = vmatpush1.bf16.msra.mxu0 %v1848_v44  ;;  %1110 = vmatmul.mubr.f32.vlgmr.msra.gmra.mrb[0].mxu1 %v146_v41  ;;  %v1868_v41 = vpack.c.bf16 %v577_v33, %v573_v32  ;;  %v1870_v44 = vpack.c.bf16 %v586_v38, %v582_v37  ;;  %v2140_v32 = vpack.c.bf16 %v1238_v26, %v1237_v24  ;;  %v1240_v38 = vld [vmem:[#allocation8 + $0x128] sm:$0xff]  ;;  %v1233_v26 = vld [vmem:[#allocation8 + $0xf0] sm:$0xff] }
 0x145   :  { %2073 = vmatpush1.bf16.msra.mxu1 %v2072_v45  ;;  %1851 = vmatprep.subr.bf16.mxu0 %v1850_v46  ;;  %v581_v45 = vld [vmem:[#allocation5 + $0xd80] sm:$0xff]  ;;  %v2110_v33 = vpack.c.bf16 %v1224_v28, %v1223_v27  ;;  %v1248_v24 = vld [vmem:[#allocation8 + $0x168] sm:$0xff]  ;;  %v1265_v28 = vld [vmem:[#allocation8 + $0x1f0] sm:$0xff] }
 0x146   :  { %2075 = vmatprep.subr.bf16.mxu1 %v2074_v50  ;;  %896 = vmatprep.mubr.f32.mxu0 %v2418_v2  ;;  %v585_v46 = vld [vmem:[#allocation5 + $0xda0] sm:$0xff]  ;;  %v590_v50 = vld [vmem:[#allocation5 + $0xdc8] sm:$0xff] }
 0x147   :  { %1180 = vmatprep.mubr.f32.mxu1 %v2418_v2  ;;  %v1872_v55 = vpack.c.bf16 %v585_v46, %v581_v45  ;;  %v2114_v45 = vpack.c.bf16 %v1226_v40, %v1225_v39  ;;  %v1209_v46 = vld [vmem:[#allocation8 + $0x30] sm:$0xff]  ;;  %v1234_v27 = vld [vmem:[#allocation8 + $0xf8] sm:$0xff]  ;;  %v599_v39 = vlaneseq }
 0x148   :  { %1853 = vmatpush1.bf16.msra.mxu0 %v1852_v56  ;;  %v2096_v56 = vpack.c.bf16 %v587_v49, %v583_v47  ;;  %v1210_v47 = vld [vmem:[#allocation8 + $0x38] sm:$0xff] }
 0x149   :  { %2077 = vmatpush1.bf16.msra.mxu1 %v2076_v57  ;;  %1855 = vmatprep.subr.bf16.mxu0 %v1854_v58  ;;  %v1874_v57 = vpack.c.bf16 %v594_v51, %v590_v50  ;;  %v589_v58 = vld [vmem:[#allocation5 + $0xdc0] sm:$0xff]  ;;  %v600_v40 = vshrl.u32 %v599_v39, 7 }
 0x14a   :  { %2079 = vmatprep.subr.bf16.mxu1 %v2078_v62  ;;  %v595_v62 = vld [vmem:[#allocation5 + $0xdf0] sm:$0xff]  ;;  %v1242_v50 = vld [vmem:[#allocation8 + $0x138] sm:$0xff]  ;;  %v1227_v51 = vld [vmem:[#allocation8 + $0xc0] sm:$0xff] }
 0x14c   :  { %1857 = vmatpush1.bf16.msra.mxu0 %v1856_v5  ;;  %v1252_v5 = vld [vmem:[#allocation8 + $0x188] sm:$0xff] }
 0x14d   :  { %2081 = vmatpush1.bf16.msra.mxu1 %v2080_v6  ;;  %1859 = vmatprep.subr.bf16.mxu0 %v1858_v7  ;;  %v1876_v6 = vpack.c.bf16 %v593_v59, %v589_v58  ;;  %v2100_v7 = vpack.c.bf16 %v595_v62, %v591_v60  ;;  %v2134_v12 = vpack.c.bf16 %v1252_v5, %v1251_v4  ;;  %v1211_v58 = vld [vmem:[#allocation8 + $0x40] sm:$0xff]  ;;  %v1212_v59 = vld [vmem:[#allocation8 + $0x48] sm:$0xff] }
 0x14e   :  { %2083 = vmatprep.subr.bf16.mxu1 %v2082_v11  ;;  %v1235_v11 = vld [vmem:[#allocation8 + $0x100] sm:$0xff]  ;;  %v1244_v62 = vld [vmem:[#allocation8 + $0x148] sm:$0xff]  ;;  %v2120_v4 = vpack.c.bf16 %v1212_v59, %v1211_v58 }
 0x14f   :  { %v2136_v20 = vpack.c.bf16 %v1236_v13, %v1235_v11  ;;  %v1243_v60 = vld [vmem:[#allocation8 + $0x140] sm:$0xff] }
 0x150   :  { %1861 = vmatpush1.bf16.msra.mxu0 %v1860_v17  ;;  %v1253_v17 = vld [vmem:[#allocation8 + $0x190] sm:$0xff]  ;;  %v2152_v5 = vpack.c.bf16 %v1244_v62, %v1243_v60 }
 0x151   :  { %2085 = vmatpush1.bf16.msra.mxu1 %v2084_v18  ;;  %1863 = vmatprep.subr.bf16.mxu0 %v1862_v19  ;;  %v1254_v18 = vld [vmem:[#allocation8 + $0x198] sm:$0xff]  ;;  %v2104_v19 = vpack.c.bf16 %v1204_v10, %v1203_v9  ;;  %v1245_v10 = vld [vmem:[#allocation8 + $0x150] sm:$0xff] }
 0x152   :  { %2087 = vmatprep.subr.bf16.mxu1 %v2086_v23  ;;  %v1206_v23 = vld [vmem:[#allocation8 + $0x18] sm:$0xff]  ;;  %v2138_v25 = vpack.c.bf16 %v1254_v18, %v1253_v17  ;;  %v2126_v17 = vpack.c.bf16 %v1232_v15, %v1231_v14  ;;  %v1264_v18 = vld [vmem:[#allocation8 + $0x1e8] sm:$0xff] }
 0x153   :  { %v1214_v9 = vld [vmem:[#allocation8 + $0x58] sm:$0xff] }
 0x154   :  { %1865 = vmatpush1.bf16.msra.mxu0 %v1864_v29  ;;  %v1255_v29 = vld [vmem:[#allocation8 + $0x1a0] sm:$0xff] }
 0x155   :  { %2089 = vmatpush1.bf16.msra.mxu1 %v2088_v30  ;;  %1867 = vmatprep.subr.bf16.mxu0 %v1866_v31  ;;  %v1256_v30 = vld [vmem:[#allocation8 + $0x1a8] sm:$0xff]  ;;  %v2108_v31 = vpack.c.bf16 %v1206_v23, %v1205_v22  ;;  %v1247_v23 = vld [vmem:[#allocation8 + $0x160] sm:$0xff] }
 0x156   :  { %2091 = vmatprep.subr.bf16.mxu1 %v2090_v35  ;;  %v1208_v35 = vld [vmem:[#allocation8 + $0x28] sm:$0xff]  ;;  %v2142_v37 = vpack.c.bf16 %v1256_v30, %v1255_v29  ;;  %v2130_v29 = vpack.c.bf16 %v1234_v27, %v1233_v26  ;;  %v1266_v30 = vld [vmem:[#allocation8 + $0x1f8] sm:$0xff] }
 0x157   :  { %v1421_v14 = vld [vmem:[#allocation11 + $0x18] sm:$0xff]  ;;  %v1428_v26 = vld [vmem:[#allocation11 + $0x50] sm:$0xff] }
 0x158   :  { %1869 = vmatpush1.bf16.msra.mxu0 %v1868_v41  ;;  %v1257_v41 = vld [vmem:[#allocation8 + $0x1b0] sm:$0xff]  ;;  %v1429_v27 = vld [vmem:[#allocation11 + $0x58] sm:$0xff] }
 0x159   :  { %2093 = vmatpush1.bf16.msra.mxu1 %v2092_v43  ;;  %1871 = vmatprep.subr.bf16.mxu0 %v1870_v44  ;;  %v2112_v43 = vpack.c.bf16 %v1208_v35, %v1207_v34  ;;  %v2144_v44 = vpack.c.bf16 %v1240_v38, %v1239_v36  ;;  %v2146_v49 = vpack.c.bf16 %v1258_v42, %v1257_v41  ;;  %v1249_v35 = vld [vmem:[#allocation8 + $0x170] sm:$0xff]  ;;  %v1250_v36 = vld [vmem:[#allocation8 + $0x178] sm:$0xff]  ;;  %v2419_v38 = vmov 0.0|0.0  }
 0x15a   :  { %2095 = vmatprep.subr.bf16.mxu1 %v2094_v48  ;;  %v1241_v48 = vld [vmem:[#allocation8 + $0x130] sm:$0xff]  ;;  %v601_v41 = vsub.s32 0, %v600_v40  ;;  %v597_v42 = vld [vmem:[#allocation7] sm:$0xf] }
 0x15c   :  { %1873 = vmatpush1.bf16.msra.mxu0 %v1872_v55  ;;  %v2116_v55 = vpack.c.bf16 %v1210_v47, %v1209_v46  ;;  %v602_v46 = vrot.slane %v597_v42, %v601_v41 }
 0x15d   :  { %2097 = vmatpush1.bf16.msra.mxu1 %v2096_v56  ;;  %1875 = vmatprep.subr.bf16.mxu0 %v1874_v57  ;;  %v2148_v56 = vpack.c.bf16 %v1242_v50, %v1241_v48  ;;  %v2118_v57 = vpack.c.bf16 %v1228_v52, %v1227_v51 }
 0x15e   :  { %2099 = vmatprep.subr.bf16.mxu1 %v2098_v61  ;;  %v2150_v61 = vpack.c.bf16 %v1260_v54, %v1259_v53 }
 0x160   :  { %1877 = vmatpush1.bf16.msra.mxu0 %v1876_v6  ;;  %v2122_v6 = vpack.c.bf16 %v1230_v0, %v1229_v63  ;;  %v1418_v0 = vld [vmem:[#allocation11] sm:$0xff] }
 0x161   :  { %2101 = vmatpush1.bf16.msra.mxu1 %v2100_v7  ;;  %2103 = vmatprep.subr.bf16.mxu0 %v2102_v8  ;;  %v2154_v7 = vpack.c.bf16 %v1262_v3, %v1261_v1  ;;  %v1213_v8 = vld [vmem:[#allocation8 + $0x50] sm:$0xff] }
 0x162   :  { %2135 = vmatprep.subr.bf16.mxu1 %v2134_v12  ;;  %v2124_v11 = vpack.c.bf16 %v1214_v9, %v1213_v8  ;;  %v1246_v12 = vld [vmem:[#allocation8 + $0x158] sm:$0xff]  ;;  %v1419_v1 = vld [vmem:[#allocation11 + $0x8] sm:$0xff] }
 0x163   :  { %897 = vmatmul.mubr.f32.vlgmr.msra.gmra.mrb[0].mxu0 %v148_v16  ;;  %v2156_v13 = vpack.c.bf16 %v1246_v12, %v1245_v10  ;;  %v2167_v10 = vpack.c.bf16 %v1419_v1, %v1418_v0 }
 0x164   :  { %1181 = vmatmul.mubr.f32.vlgmr.msra.gmra.mrb[0].mxu1 %v148_v16  ;;  %2105 = vmatpush3.bf16.msra.mxu0 %v2104_v19  ;;  %v1263_v16 = vld [vmem:[#allocation8 + $0x1e0] sm:$0xff] }
 0x165   :  { %2137 = vmatpush3.bf16.msra.mxu1 %v2136_v20  ;;  %2107 = vmatprep.subr.bf16.mxu0 %v2106_v21  ;;  %v1215_v19 = vld [vmem:[#allocation8 + $0x60] sm:$0xff]  ;;  %v1216_v20 = vld [vmem:[#allocation8 + $0x68] sm:$0xff]  ;;  %v2158_v21 = vpack.c.bf16 %v1264_v18, %v1263_v16 }
 0x166   :  { %2139 = vmatprep.subr.bf16.mxu1 %v2138_v25  ;;  %v2128_v22 = vpack.c.bf16 %v1216_v20, %v1215_v19  ;;  %v2160_v25 = vpack.c.bf16 %v1248_v24, %v1247_v23  ;;  %v1423_v18 = vld [vmem:[#allocation11 + $0x28] sm:$0xff]  ;;  %v1424_v20 = vld [vmem:[#allocation11 + $0x30] sm:$0xff]  ;;  %v1426_v23 = vld [vmem:[#allocation11 + $0x40] sm:$0xff] }
 0x167   :  { %v1427_v24 = vld [vmem:[#allocation11 + $0x48] sm:$0xff] }
 0x168   :  { %2109 = vmatpush3.bf16.msra.mxu0 %v2108_v31  ;;  %v1217_v31 = vld [vmem:[#allocation8 + $0x70] sm:$0xff] }
 0x169   :  { %2141 = vmatpush3.bf16.msra.mxu1 %v2140_v32  ;;  %2111 = vmatprep.subr.bf16.mxu0 %v2110_v33  ;;  %v1218_v32 = vld [vmem:[#allocation8 + $0x78] sm:$0xff]  ;;  %v2162_v33 = vpack.c.bf16 %v1266_v30, %v1265_v28  ;;  %v2182_v28 = vpack.c.bf16 %v1429_v27, %v1428_v26  ;;  %v1431_v30 = vld [vmem:[#allocation11 + $0x68] sm:$0xff] }
 0x16a   :  { %2143 = vmatprep.subr.bf16.mxu1 %v2142_v37  ;;  %v2132_v34 = vpack.c.bf16 %v1218_v32, %v1217_v31  ;;  %v2164_v37 = vpack.c.bf16 %v1250_v36, %v1249_v35  ;;  %v1432_v32 = vld [vmem:[#allocation11 + $0x70] sm:$0xff] }
 0x16c   :  { %2113 = vmatpush3.bf16.msra.mxu0 %v2112_v43  ;;  %v609_v43 = vsub.s32 2, %v600_v40 }
 0x16d   :  { %2145 = vmatpush3.bf16.msra.mxu1 %v2144_v44  ;;  %2115 = vmatprep.subr.bf16.mxu0 %v2114_v45  ;;  %v605_v44 = vsub.s32 1, %v600_v40  ;;  %v613_v45 = vsub.s32 3, %v600_v40 }
 0x16e   :  { %2147 = vmatprep.subr.bf16.mxu1 %v2146_v49  ;;  %v610_v47 = vrot.slane %v597_v42, %v609_v43 }
 0x16f   :  { %v606_v48 = vrot.slane %v597_v42, %v605_v44  ;;  %v614_v49 = vrot.slane %v597_v42, %v613_v45 }
 0x170   :  { %2117 = vmatpush3.bf16.msra.mxu0 %v2116_v55 }
 0x171   :  { %2149 = vmatpush3.bf16.msra.mxu1 %v2148_v56  ;;  %2119 = vmatprep.subr.bf16.mxu0 %v2118_v57 }
 0x172   :  { %2151 = vmatprep.subr.bf16.mxu1 %v2150_v61 }
 0x174   :  { %2121 = vmatpush3.bf16.msra.mxu0 %v2120_v4 }
 0x175   :  { %2153 = vmatpush3.bf16.msra.mxu1 %v2152_v5  ;;  %2123 = vmatprep.subr.bf16.mxu0 %v2122_v6 }
 0x176   :  { %2155 = vmatprep.subr.bf16.mxu1 %v2154_v7 }
 0x178   :  { %2125 = vmatpush3.bf16.msra.mxu0 %v2124_v11 }
 0x179   :  { %2157 = vmatpush3.bf16.msra.mxu1 %v2156_v13  ;;  %2127 = vmatprep.subr.bf16.mxu0 %v2126_v17  ;;  %v1420_v13 = vld [vmem:[#allocation11 + $0x10] sm:$0xff]  ;;  %v1422_v17 = vld [vmem:[#allocation11 + $0x20] sm:$0xff] }
 0x17a   :  { %2159 = vmatprep.subr.bf16.mxu1 %v2158_v21  ;;  %v2170_v16 = vpack.c.bf16 %v1421_v14, %v1420_v13  ;;  %v2173_v19 = vpack.c.bf16 %v1423_v18, %v1422_v17  ;;  %v1425_v21 = vld [vmem:[#allocation11 + $0x38] sm:$0xff] }
 0x17c   :  { %2129 = vmatpush3.bf16.msra.mxu0 %v2128_v22  ;;  %v2176_v22 = vpack.c.bf16 %v1425_v21, %v1424_v20 }
 0x17d   :  { %2161 = vmatpush3.bf16.msra.mxu1 %v2160_v25  ;;  %2131 = vmatprep.subr.bf16.mxu0 %v2130_v29  ;;  %v2179_v25 = vpack.c.bf16 %v1427_v24, %v1426_v23  ;;  %v1430_v29 = vld [vmem:[#allocation11 + $0x60] sm:$0xff] }
 0x17e   :  { %2163 = vmatprep.subr.bf16.mxu1 %v2162_v33  ;;  %v2185_v31 = vpack.c.bf16 %v1431_v30, %v1430_v29  ;;  %v1433_v33 = vld [vmem:[#allocation11 + $0x78] sm:$0xff] }
 0x180   :  { %2133 = vmatpush3.bf16.msra.mxu0 %v2132_v34  ;;  %v2188_v34 = vpack.c.bf16 %v1433_v33, %v1432_v32 }
 0x181   :  { %2165 = vmatpush3.bf16.msra.mxu1 %v2164_v37  ;;  %2166 = vmatprep.subr.bf16.mxu0 %v2419_v38  ;;  %v1530_v37 = vld [vmem:[#allocation10] ss:$0 sm:$0xff] }
 0x236   :  { %v898_v50 = vpop.f32.mrb[0].mxu0 }
 0x237   :  { %v2190_v51 = vadd.f32 %v898_v50, %v602_v46  ;;  %v1182_v52 = vpop.f32.mrb[0].mxu1  ;;  %v900_v53 = vpop.f32.mrb[1].mxu0 }
 0x238   :  { %v2192_v54 = vadd.f32 %v1182_v52, %v610_v47  ;;  %v2191_v55 = vadd.f32 %v900_v53, %v606_v48  ;;  %v1184_v56 = vpop.f32.mrb[1].mxu1  ;;  %v1531_v48 = vld [vmem:[#allocation13] ss:$0 sm:$0xff] }
 0x239   :  { %v1187_v57 = vmul.f32 %v2190_v51, %v2190_v51  ;;  %v2193_v58 = vadd.f32 %v1184_v56, %v614_v49 }
 0x23a   :  { %v1189_v59 = vmul.f32 %v2192_v54, %v2192_v54  ;;  %v1188_v60 = vmul.f32 %v2191_v55, %v2191_v55 }
 0x23b   :  { %v1191_v61 = vadd.f32 %v2190_v51, %v1187_v57  ;;  %v1195_v62 = vmul.f32 %v2190_v51, %v1187_v57  ;;  %v1190_v63 = vmul.f32 %v2193_v58, %v2193_v58 }
 0x23c   :  { %v1193_v3 = vadd.f32 %v2192_v54, %v1189_v59  ;;  %v1197_v4 = vmul.f32 %v2192_v54, %v1189_v59  ;;  %v1192_v5 = vadd.f32 %v2191_v55, %v1188_v60  ;;  %v1196_v6 = vmul.f32 %v2191_v55, %v1188_v60 }
 0x23d   :  { %v1194_v7 = vadd.f32 %v2193_v58, %v1190_v63  ;;  %v1198_v8 = vmul.f32 %v2193_v58, %v1190_v63  ;;  %v1199_v11 = vadd.f32 %v1195_v62, %v1191_v61 }
 0x23e   :  { %v1200_v9 = vadd.f32 %v1196_v6, %v1192_v5  ;;  %v1201_v15 = vadd.f32 %v1197_v4, %v1193_v3 }
 0x23f   :  { %v1202_v12 = vadd.f32 %v1198_v8, %v1194_v7 }
 0x240   :  { %1338 = vmatprep.mubr.f32.mxu0 %v1200_v9 }
 0x241   :  { %1408 = vmatprep.mubr.f32.mxu1 %v1202_v12  ;;  %1339 = vmatmul.mubr.f32.vlgmr.msra.gmra.mrb[2].mxu0 %v1199_v11 }
 0x242   :  { %1409 = vmatmul.mubr.f32.vlgmr.msra.gmra.mrb[2].mxu1 %v1201_v15  ;;  %2168 = vmatpush3.bf16.msra.mxu0 %v2167_v10 }
 0x243   :  { %2169 = vmatprep.subr.bf16.mxu0 %v2419_v38  ;;  %1651 = vmatprep.mubr.msk.f32.mxu0 %vm2420_vm0, %v2418_v2 }
 0x246   :  { %2171 = vmatpush3.bf16.msra.mxu0 %v2170_v16 }
 0x247   :  { %2172 = vmatprep.subr.bf16.mxu0 %v2419_v38 }
 0x24a   :  { %2174 = vmatpush3.bf16.msra.mxu0 %v2173_v19 }
 0x24b   :  { %2175 = vmatprep.subr.bf16.mxu0 %v2419_v38 }
 0x24e   :  { %2177 = vmatpush3.bf16.msra.mxu0 %v2176_v22 }
 0x24f   :  { %2178 = vmatprep.subr.bf16.mxu0 %v2419_v38 }
 0x252   :  { %2180 = vmatpush3.bf16.msra.mxu0 %v2179_v25 }
 0x253   :  { %2181 = vmatprep.subr.bf16.mxu0 %v2419_v38 }
 0x256   :  { %2183 = vmatpush3.bf16.msra.mxu0 %v2182_v28 }
 0x257   :  { %2184 = vmatprep.subr.bf16.mxu0 %v2419_v38 }
 0x25a   :  { %2186 = vmatpush3.bf16.msra.mxu0 %v2185_v31 }
 0x25b   :  { %2187 = vmatprep.subr.bf16.mxu0 %v2419_v38 }
 0x25e   :  { %2189 = vmatpush3.bf16.msra.mxu0 %v2188_v34 }
 0x314   :  { %v1564_v35 = vpop.f32.mrb[2].mxu0 }
 0x315   :  { %v1599_v36 = vpop.f32.mrb[2].mxu1  ;;  %v1565_v39 = vpop.f32.mrb[3].mxu0 }
 0x316   :  { %v1566_v40 = vadd.f32 %v1565_v39, %v1564_v35  ;;  %v1600_v41 = vpop.f32.mrb[3].mxu1 }
 0x317   :  { %v1601_v42 = vadd.f32 %v1600_v41, %v1599_v36 }
 0x318   :  { %v1341_v43 = vadd.f32 %v1566_v40, %v1530_v37 }
 0x31a   :  { %v1411_v44 = vadd.f32 %v1601_v42, %v1341_v43 }
 0x31c   :  { %v1414_v45 = vmul.f32 %v1411_v44, %v1411_v44 }
 0x31e   :  { %v1415_v46 = vadd.f32 %v1414_v45, %v1411_v44  ;;  %v1416_v47 = vmul.f32 %v1414_v45, %v1411_v44 }
 0x320   :  { %v1417_v38 = vadd.f32 %v1416_v47, %v1415_v46 }
 0x322   :  { %1652 = vmatmul.mubr.f32.vlgmr.msra.gmra.mrb[4].mxu0 %v1417_v38 }
 0x3f5   :  { %v1507_v49 = vpop.f32.mrb[4].mxu0 }
 0x3f6   :  { %v1508_v2 = vadd.f32 %v1531_v48, %v1507_v49  ;;  %v1653_v50 = vpop.f32.mrb[5].mxu0 }
 0x3f8   :  { %1511 = vst [vmem:[#allocation14] sm:$0xff] %v1508_v2 }
 0x3f9   :  { %2386 = shalt.err (!%p2383_p4)
}
 0x3fa   :  { %s2387_s15 = scalar_lea.hbm %s2576_s7, 128 }
 0x3fb   :  { %p2388_p5 = scmp.ne.s32.totalorder %s2576_s7, %s2387_s15  ;;  %p2391_p6 = scmp.lt.u32.totalorder %s2387_s15, %s2576_s7 }
 0x3fd   :  { %p2393_p7 = pnand %p2391_p6, %p2388_p5 }
 0x3ff   :  { %2396 = shalt.err (!%p2393_p7)
}
 0x400   :  { %1521 = dma.vmem_to_hbm [thread:$0]  %s1519_s13, 128, %s2576_s7, [#allocation4]  }
 0x401   :  { %2405 = dma.done.wait [#allocation4], 128  }
 0x402   :  { %2406 = vsyncadd [#allocation4], 4294967168 }
 0x403   :  { %1525 = vsyncpa [#allocation3], 1 }
 0x404   :  { %1526 = vsyncpa [#allocation6], 1 }
 0x405   :  { %1527 = vsyncpa [#allocation9], 1 }
 0x406   :  { %1528 = vsyncpa [#allocation12], 1 }
 0x407   :  { %1529 = vsyncpa [#allocation4], 1 }

</bundles_post_ra>
